<compile_context>
chip_gen: v7x
topology: tpu7x:2x2x1
jax: 0.10.0
libtpu: 0.0.40
codegen_flags: <defaults>
</compile_context>

<pallas_src>
import jax
import jax.numpy as jnp
from jax.experimental import pallas as pl
from jax.experimental.pallas import tpu as pltpu

# ---------------------------------------------------------------------------
# Model hyper-parameters (synthetic, deterministic init — no checkpoint load)
# ---------------------------------------------------------------------------
VOCAB = 100
MAX_POS = 64
TYPE_VOCAB = 2
BATCH = 2
SEQ = 16
HIDDEN = 64
NUM_HEADS = 2
HEAD_DIM = HIDDEN // NUM_HEADS
FFN = 128
NUM_CLASSES = 3
LN_EPS = 1e-12

OUT_ROWS = 8     # padded sublane extent of the logits block
OUT_COLS = 128   # padded lane extent of the logits block (lane-dense store)


# ---------------------------------------------------------------------------
# Fused Pallas kernel: encoder block + mean pooling + classification head
# ---------------------------------------------------------------------------
def _ln(v, g, b):
    mu = jnp.mean(v, axis=-1, keepdims=True)
    var = jnp.mean((v - mu) ** 2, axis=-1, keepdims=True)
    return (v - mu) * jax.lax.rsqrt(var + LN_EPS) * g + b


def _fused_kernel(
    x_ref, mask_ref,
    ln_emb_g_ref, ln_emb_b_ref,
    w_qkv_ref, b_qkv_ref,
    w_o_ref, b_o_ref,
    ln1_g_ref, ln1_b_ref,
    w_f1_ref, b_f1_ref,
    w_f2_ref, b_f2_ref,
    ln2_g_ref, ln2_b_ref,
    w_head_ref, b_head_ref,
    out_ref,
):
    B, S, H, NH, DH = BATCH, SEQ, HIDDEN, NUM_HEADS, HEAD_DIM

    mask = mask_ref[...]                                             # (B, S) f32
    x0 = _ln(x_ref[...], ln_emb_g_ref[...], ln_emb_b_ref[...])       # (B*S, H)

    # ---- fused QKV projection: one MXU matmul with lane-dense (192) output
    qkv = (
        jnp.dot(x0, w_qkv_ref[...], preferred_element_type=jnp.float32)
        + b_qkv_ref[...]
    )
    scale = 1.0 / (DH ** 0.5)
    q = qkv[:, :H] * scale          # fold 1/sqrt(dh) into q once
    k = qkv[:, H:2 * H]
    v = qkv[:, 2 * H:]

    # ---- per-(batch, head) attention, fully unrolled (B*NH = 4 tiny blocks)
    ctx_rows = []
    for b in range(B):
        bias_b = (1.0 - mask[b:b + 1, :]) * -1e9                     # (1, S)
        rows = slice(b * S, (b + 1) * S)
        head_ctx = []
        for h in range(NH):
            cols = slice(h * DH, (h + 1) * DH)
            q_bh = q[rows, cols]                                     # (S, dh)
            k_bh = k[rows, cols]
            v_bh = v[rows, cols]
            s = jnp.dot(q_bh, k_bh.T, preferred_element_type=jnp.float32) + bias_b
            s = s - jnp.max(s, axis=-1, keepdims=True)
            p = jnp.exp(s)
            p = p * pl.reciprocal(jnp.sum(p, axis=-1, keepdims=True), approx=True)
            head_ctx.append(jnp.dot(p, v_bh, preferred_element_type=jnp.float32))
        ctx_rows.append(jnp.concatenate(head_ctx, axis=1))           # (S, H)
    ctx = jnp.concatenate(ctx_rows, axis=0)                          # (B*S, H)

    attn_out = (
        jnp.dot(ctx, w_o_ref[...], preferred_element_type=jnp.float32)
        + b_o_ref[...]
    )
    x1 = _ln(x0 + attn_out, ln1_g_ref[...], ln1_b_ref[...])

    # ---- feed-forward
    hdn = (
        jnp.dot(x1, w_f1_ref[...], preferred_element_type=jnp.float32)
        + b_f1_ref[...]
    )
    hdn = jax.nn.gelu(hdn)
    hdn = (
        jnp.dot(hdn, w_f2_ref[...], preferred_element_type=jnp.float32)
        + b_f2_ref[...]
    )
    x2 = _ln(x1 + hdn, ln2_g_ref[...], ln2_b_ref[...])               # token embeddings

    # ---- masked mean pooling (numerator as a matmul) + classification head
    emb_rows = []
    for b in range(B):
        rows = slice(b * S, (b + 1) * S)
        mask_b = mask[b:b + 1, :]                                    # (1, S)
        num = jnp.dot(mask_b, x2[rows, :], preferred_element_type=jnp.float32)  # (1, H)
        den = jnp.maximum(jnp.sum(mask_b, axis=1, keepdims=True), 1e-9)          # clamp(min=1e-9)
        emb_rows.append(num / den)
    emb = jnp.concatenate(
        emb_rows + [jnp.zeros((OUT_ROWS - B, H), jnp.float32)], axis=0
    )                                                                # (8, H)

    out_ref[...] = (
        jnp.dot(emb, w_head_ref[...], preferred_element_type=jnp.float32)
        + b_head_ref[...]
    ).astype(out_ref.dtype)                                          # (8, 128) lane-dense store


def _full_spec(shape):
    zeros = (0,) * len(shape)
    return pl.BlockSpec(shape, lambda i, _z=zeros: _z)


# ---------------------------------------------------------------------------
# Params
# ---------------------------------------------------------------------------
def init_params(key):
    ks = jax.random.split(key, 16)
    s = 0.02
    return {
        "word_emb": s * jax.random.normal(ks[0], (VOCAB, HIDDEN), jnp.float32),
        "pos_emb": s * jax.random.normal(ks[1], (MAX_POS, HIDDEN), jnp.float32),
        "type_emb": s * jax.random.normal(ks[2], (TYPE_VOCAB, HIDDEN), jnp.float32),
        "ln_emb_g": jnp.ones((HIDDEN,), jnp.float32),
        "ln_emb_b": jnp.zeros((HIDDEN,), jnp.float32),
        "wq": s * jax.random.normal(ks[3], (HIDDEN, HIDDEN), jnp.float32),
        "bq": jnp.zeros((HIDDEN,), jnp.float32),
        "wk": s * jax.random.normal(ks[4], (HIDDEN, HIDDEN), jnp.float32),
        "bk": jnp.zeros((HIDDEN,), jnp.float32),
        "wv": s * jax.random.normal(ks[5], (HIDDEN, HIDDEN), jnp.float32),
        "bv": jnp.zeros((HIDDEN,), jnp.float32),
        "wo": s * jax.random.normal(ks[6], (HIDDEN, HIDDEN), jnp.float32),
        "bo": jnp.zeros((HIDDEN,), jnp.float32),
        "ln1_g": jnp.ones((HIDDEN,), jnp.float32),
        "ln1_b": jnp.zeros((HIDDEN,), jnp.float32),
        "w_ffn1": s * jax.random.normal(ks[7], (HIDDEN, FFN), jnp.float32),
        "b_ffn1": jnp.zeros((FFN,), jnp.float32),
        "w_ffn2": s * jax.random.normal(ks[8], (FFN, HIDDEN), jnp.float32),
        "b_ffn2": jnp.zeros((HIDDEN,), jnp.float32),
        "ln2_g": jnp.ones((HIDDEN,), jnp.float32),
        "ln2_b": jnp.zeros((HIDDEN,), jnp.float32),
        "w_head": s * jax.random.normal(ks[9], (HIDDEN, NUM_CLASSES), jnp.float32),
        "b_head": jnp.zeros((NUM_CLASSES,), jnp.float32),
    }


def prepare_fused_params(p):
    """One-time weight fusion/padding for the fused kernel."""
    return {
        "word_emb": p["word_emb"],
        "pos_emb": p["pos_emb"],
        "type_emb": p["type_emb"],
        "ln_emb_g": p["ln_emb_g"][None, :],
        "ln_emb_b": p["ln_emb_b"][None, :],
        "w_qkv": jnp.concatenate([p["wq"], p["wk"], p["wv"]], axis=1),       # (H, 3H)
        "b_qkv": jnp.concatenate([p["bq"], p["bk"], p["bv"]])[None, :],      # (1, 3H)
        "wo": p["wo"],
        "bo": p["bo"][None, :],
        "ln1_g": p["ln1_g"][None, :],
        "ln1_b": p["ln1_b"][None, :],
        "w_ffn1": p["w_ffn1"],
        "b_ffn1": p["b_ffn1"][None, :],
        "w_ffn2": p["w_ffn2"],
        "b_ffn2": p["b_ffn2"][None, :],
        "ln2_g": p["ln2_g"][None, :],
        "ln2_b": p["ln2_b"][None, :],
        "w_head_pad": jnp.pad(p["w_head"], ((0, 0), (0, OUT_COLS - NUM_CLASSES))),
        "b_head_pad": jnp.pad(p["b_head"], (0, OUT_COLS - NUM_CLASSES))[None, :],
    }


# ---------------------------------------------------------------------------
# Forward (mirrors OnnxSetFitModel.forward)
# ---------------------------------------------------------------------------
@jax.jit
def onnx_setfit_forward(fp, input_ids, attention_mask, token_type_ids):
    B, S = input_ids.shape
    # TODO(synk): embedding-table gathers stay in plain JAX (no clean small-scale
    # Pallas gather equivalent at these shapes).
    positions = jnp.arange(S, dtype=jnp.int32)[None, :]
    x = (
        jnp.take(fp["word_emb"], input_ids, axis=0)
        + jnp.take(fp["pos_emb"], positions, axis=0)
        + jnp.take(fp["type_emb"], token_type_ids, axis=0)
    ).reshape(B * S, HIDDEN)
    mask_f = attention_mask.astype(jnp.float32)

    logits_pad = pl.pallas_call(
        _fused_kernel,
        out_shape=jax.ShapeDtypeStruct((OUT_ROWS, OUT_COLS), jnp.float32),
        grid=(1,),
        in_specs=[
            _full_spec((B * S, HIDDEN)),                 # x
            _full_spec((B, S)),                          # attention mask
            _full_spec((1, HIDDEN)), _full_spec((1, HIDDEN)),       # ln_emb
            _full_spec((HIDDEN, 3 * HIDDEN)), _full_spec((1, 3 * HIDDEN)),  # qkv
            _full_spec((HIDDEN, HIDDEN)), _full_spec((1, HIDDEN)),  # wo/bo
            _full_spec((1, HIDDEN)), _full_spec((1, HIDDEN)),       # ln1
            _full_spec((HIDDEN, FFN)), _full_spec((1, FFN)),        # ffn1
            _full_spec((FFN, HIDDEN)), _full_spec((1, HIDDEN)),     # ffn2
            _full_spec((1, HIDDEN)), _full_spec((1, HIDDEN)),       # ln2
            _full_spec((HIDDEN, OUT_COLS)), _full_spec((1, OUT_COLS)),  # head (padded)
        ],
        out_specs=_full_spec((OUT_ROWS, OUT_COLS)),
        compiler_params=pltpu.CompilerParams(dimension_semantics=("arbitrary",)),
    )(
        x, mask_f,
        fp["ln_emb_g"], fp["ln_emb_b"],
        fp["w_qkv"], fp["b_qkv"],
        fp["wo"], fp["bo"],
        fp["ln1_g"], fp["ln1_b"],
        fp["w_ffn1"], fp["b_ffn1"],
        fp["w_ffn2"], fp["b_ffn2"],
        fp["ln2_g"], fp["ln2_b"],
        fp["w_head_pad"], fp["b_head_pad"],
    )
    return logits_pad[:B, :NUM_CLASSES]


if __name__ == "__main__":
    key = jax.random.PRNGKey(0)
    pkey, ikey = jax.random.split(key)
    params = init_params(pkey)
    fused_params = prepare_fused_params(params)

    input_ids = jax.random.randint(ikey, (BATCH, SEQ), 0, VOCAB, dtype=jnp.int32)
    token_type_ids = jnp.zeros((BATCH, SEQ), dtype=jnp.int32)
    # second example has 4 padding positions
    attention_mask = jnp.concatenate(
        [
            jnp.ones((1, SEQ), jnp.int32),
            jnp.concatenate(
                [jnp.ones((1, SEQ - 4), jnp.int32), jnp.zeros((1, 4), jnp.int32)],
                axis=1,
            ),
        ],
        axis=0,
    )

    out = onnx_setfit_forward(fused_params, input_ids, attention_mask, token_type_ids)
    jax.block_until_ready(out)
    assert out.shape == (BATCH, NUM_CLASSES) and out.dtype == jnp.float32
    print("KERNEL_OK")
</pallas_src>

<mosaic_0001>
module attributes {stable_mosaic.version = 11 : i64} {
  func.func @_fused_kernel(%arg0: i32, %arg1: memref<32x64xf32, #tpu.memory_space<vmem>>, %arg2: memref<2x16xf32, #tpu.memory_space<vmem>>, %arg3: memref<1x64xf32, #tpu.memory_space<vmem>>, %arg4: memref<1x64xf32, #tpu.memory_space<vmem>>, %arg5: memref<64x192xf32, #tpu.memory_space<vmem>>, %arg6: memref<1x192xf32, #tpu.memory_space<vmem>>, %arg7: memref<64x64xf32, #tpu.memory_space<vmem>>, %arg8: memref<1x64xf32, #tpu.memory_space<vmem>>, %arg9: memref<1x64xf32, #tpu.memory_space<vmem>>, %arg10: memref<1x64xf32, #tpu.memory_space<vmem>>, %arg11: memref<64x128xf32, #tpu.memory_space<vmem>>, %arg12: memref<1x128xf32, #tpu.memory_space<vmem>>, %arg13: memref<128x64xf32, #tpu.memory_space<vmem>>, %arg14: memref<1x64xf32, #tpu.memory_space<vmem>>, %arg15: memref<1x64xf32, #tpu.memory_space<vmem>>, %arg16: memref<1x64xf32, #tpu.memory_space<vmem>>, %arg17: memref<64x128xf32, #tpu.memory_space<vmem>>, %arg18: memref<1x128xf32, #tpu.memory_space<vmem>>, %arg19: memref<8x128xf32, #tpu.memory_space<vmem>>) attributes {dimension_semantics = [#tpu.dimension_semantics<arbitrary>], iteration_bounds = array<i64: 1>, scalar_prefetch = 0 : i64, scratch_operands = 0 : i64, tpu.core_type = #tpu.core_type<tc>, window_params = [{pipeline_mode = #tpu.pipeline_mode<synchronous>, transform_indices = @transform_0, window_bounds = array<i64: 32, 64>}, {pipeline_mode = #tpu.pipeline_mode<synchronous>, transform_indices = @transform_1, window_bounds = array<i64: 2, 16>}, {pipeline_mode = #tpu.pipeline_mode<synchronous>, transform_indices = @transform_2, window_bounds = array<i64: 1, 64>}, {pipeline_mode = #tpu.pipeline_mode<synchronous>, transform_indices = @transform_3, window_bounds = array<i64: 1, 64>}, {pipeline_mode = #tpu.pipeline_mode<synchronous>, transform_indices = @transform_4, window_bounds = array<i64: 64, 192>}, {pipeline_mode = #tpu.pipeline_mode<synchronous>, transform_indices = @transform_5, window_bounds = array<i64: 1, 192>}, {pipeline_mode = #tpu.pipeline_mode<synchronous>, transform_indices = @transform_6, window_bounds = array<i64: 64, 64>}, {pipeline_mode = #tpu.pipeline_mode<synchronous>, transform_indices = @transform_7, window_bounds = array<i64: 1, 64>}, {pipeline_mode = #tpu.pipeline_mode<synchronous>, transform_indices = @transform_8, window_bounds = array<i64: 1, 64>}, {pipeline_mode = #tpu.pipeline_mode<synchronous>, transform_indices = @transform_9, window_bounds = array<i64: 1, 64>}, {pipeline_mode = #tpu.pipeline_mode<synchronous>, transform_indices = @transform_10, window_bounds = array<i64: 64, 128>}, {pipeline_mode = #tpu.pipeline_mode<synchronous>, transform_indices = @transform_11, window_bounds = array<i64: 1, 128>}, {pipeline_mode = #tpu.pipeline_mode<synchronous>, transform_indices = @transform_12, window_bounds = array<i64: 128, 64>}, {pipeline_mode = #tpu.pipeline_mode<synchronous>, transform_indices = @transform_13, window_bounds = array<i64: 1, 64>}, {pipeline_mode = #tpu.pipeline_mode<synchronous>, transform_indices = @transform_14, window_bounds = array<i64: 1, 64>}, {pipeline_mode = #tpu.pipeline_mode<synchronous>, transform_indices = @transform_15, window_bounds = array<i64: 1, 64>}, {pipeline_mode = #tpu.pipeline_mode<synchronous>, transform_indices = @transform_16, window_bounds = array<i64: 64, 128>}, {pipeline_mode = #tpu.pipeline_mode<synchronous>, transform_indices = @transform_17, window_bounds = array<i64: 1, 128>}, {pipeline_mode = #tpu.pipeline_mode<synchronous>, transform_indices = @transform_18, window_bounds = array<i64: 8, 128>}]} {
    %c0 = arith.constant 0 : index
    %c0_0 = arith.constant 0 : index
    %0 = vector.load %arg2[%c0, %c0_0] : memref<2x16xf32, #tpu.memory_space<vmem>>, vector<2x16xf32>
    %c0_1 = arith.constant 0 : index
    %c0_2 = arith.constant 0 : index
    %1 = vector.load %arg1[%c0_1, %c0_2] : memref<32x64xf32, #tpu.memory_space<vmem>>, vector<32x64xf32>
    %c0_3 = arith.constant 0 : index
    %c0_4 = arith.constant 0 : index
    %2 = vector.load %arg3[%c0_3, %c0_4] : memref<1x64xf32, #tpu.memory_space<vmem>>, vector<1x64xf32>
    %c0_5 = arith.constant 0 : index
    %c0_6 = arith.constant 0 : index
    %3 = vector.load %arg4[%c0_5, %c0_6] : memref<1x64xf32, #tpu.memory_space<vmem>>, vector<1x64xf32>
    %cst = arith.constant dense<0.000000e+00> : vector<32xf32>
    %4 = vector.multi_reduction <add>, %1, %cst [1] : vector<32x64xf32> to vector<32xf32>
    %5 = vector.shape_cast %4 : vector<32xf32> to vector<32x1xf32>
    %cst_7 = arith.constant 6.400000e+01 : f32
    %6 = vector.broadcast %cst_7 : f32 to vector<32x1xf32>
    %7 = arith.divf %5, %6 : vector<32x1xf32>
    %8 = vector.broadcast %7 : vector<32x1xf32> to vector<32x64xf32>
    %9 = arith.subf %1, %8 : vector<32x64xf32>
    %10 = arith.mulf %9, %9 : vector<32x64xf32>
    %cst_8 = arith.constant dense<0.000000e+00> : vector<32xf32>
    %11 = vector.multi_reduction <add>, %10, %cst_8 [1] : vector<32x64xf32> to vector<32xf32>
    %12 = vector.shape_cast %11 : vector<32xf32> to vector<32x1xf32>
    %cst_9 = arith.constant 6.400000e+01 : f32
    %13 = vector.broadcast %cst_9 : f32 to vector<32x1xf32>
    %14 = arith.divf %12, %13 : vector<32x1xf32>
    %15 = vector.broadcast %7 : vector<32x1xf32> to vector<32x64xf32>
    %16 = arith.subf %1, %15 : vector<32x64xf32>
    %cst_10 = arith.constant 9.99999996E-13 : f32
    %17 = vector.broadcast %cst_10 : f32 to vector<32x1xf32>
    %18 = arith.addf %14, %17 : vector<32x1xf32>
    %19 = math.rsqrt %18 : vector<32x1xf32>
    %20 = vector.broadcast %19 : vector<32x1xf32> to vector<32x64xf32>
    %21 = arith.mulf %16, %20 : vector<32x64xf32>
    %22 = vector.broadcast %2 : vector<1x64xf32> to vector<32x64xf32>
    %23 = arith.mulf %21, %22 : vector<32x64xf32>
    %24 = vector.broadcast %3 : vector<1x64xf32> to vector<32x64xf32>
    %25 = arith.addf %23, %24 : vector<32x64xf32>
    %c0_11 = arith.constant 0 : index
    %c0_12 = arith.constant 0 : index
    %26 = vector.load %arg5[%c0_11, %c0_12] : memref<64x192xf32, #tpu.memory_space<vmem>>, vector<64x192xf32>
    %cst_13 = arith.constant dense<0.000000e+00> : vector<32x192xf32>
    %27 = tpu.matmul %25, %26, %cst_13 {dimension_numbers = #tpu.dot_dimension_numbers<[1], [0], [0], [1], [0, 0, 1, 1], [], []>} : vector<32x64xf32>, vector<64x192xf32>, vector<32x192xf32> -> vector<32x192xf32>
    %c0_14 = arith.constant 0 : index
    %c0_15 = arith.constant 0 : index
    %28 = vector.load %arg6[%c0_14, %c0_15] : memref<1x192xf32, #tpu.memory_space<vmem>>, vector<1x192xf32>
    %29 = vector.broadcast %28 : vector<1x192xf32> to vector<32x192xf32>
    %30 = arith.addf %27, %29 : vector<32x192xf32>
    %31 = vector.extract_strided_slice %30 {offsets = [0, 0], sizes = [32, 64], strides = [1, 1]} : vector<32x192xf32> to vector<32x64xf32>
    %cst_16 = arith.constant 0.176776692 : f32
    %32 = vector.broadcast %cst_16 : f32 to vector<32x64xf32>
    %33 = arith.mulf %31, %32 : vector<32x64xf32>
    %34 = vector.extract_strided_slice %30 {offsets = [0, 64], sizes = [32, 64], strides = [1, 1]} : vector<32x192xf32> to vector<32x64xf32>
    %35 = vector.extract_strided_slice %30 {offsets = [0, 128], sizes = [32, 64], strides = [1, 1]} : vector<32x192xf32> to vector<32x64xf32>
    %36 = vector.extract_strided_slice %0 {offsets = [0, 0], sizes = [1, 16], strides = [1, 1]} : vector<2x16xf32> to vector<1x16xf32>
    %cst_17 = arith.constant 1.000000e+00 : f32
    %37 = vector.broadcast %cst_17 : f32 to vector<1x16xf32>
    %38 = arith.subf %37, %36 : vector<1x16xf32>
    %cst_18 = arith.constant -1.000000e+09 : f32
    %39 = vector.broadcast %cst_18 : f32 to vector<1x16xf32>
    %40 = arith.mulf %38, %39 : vector<1x16xf32>
    %41 = vector.extract_strided_slice %33 {offsets = [0, 0], sizes = [16, 32], strides = [1, 1]} : vector<32x64xf32> to vector<16x32xf32>
    %42 = vector.extract_strided_slice %34 {offsets = [0, 0], sizes = [16, 32], strides = [1, 1]} : vector<32x64xf32> to vector<16x32xf32>
    %43 = vector.extract_strided_slice %35 {offsets = [0, 0], sizes = [16, 32], strides = [1, 1]} : vector<32x64xf32> to vector<16x32xf32>
    %44 = tpu.transpose %42, [1, 0] : vector<16x32xf32> -> vector<32x16xf32>
    %cst_19 = arith.constant dense<0.000000e+00> : vector<16x16xf32>
    %45 = tpu.matmul %41, %44, %cst_19 {dimension_numbers = #tpu.dot_dimension_numbers<[1], [0], [0], [1], [0, 0, 1, 1], [], []>} : vector<16x32xf32>, vector<32x16xf32>, vector<16x16xf32> -> vector<16x16xf32>
    %46 = vector.broadcast %40 : vector<1x16xf32> to vector<16x16xf32>
    %47 = arith.addf %45, %46 : vector<16x16xf32>
    %cst_20 = arith.constant dense<0xFF800000> : vector<16xf32>
    %48 = vector.multi_reduction <maximumf>, %47, %cst_20 [1] : vector<16x16xf32> to vector<16xf32>
    %49 = vector.shape_cast %48 : vector<16xf32> to vector<16x1xf32>
    %50 = vector.broadcast %49 : vector<16x1xf32> to vector<16x16xf32>
    %51 = arith.subf %47, %50 : vector<16x16xf32>
    %52 = math.exp %51 : vector<16x16xf32>
    %cst_21 = arith.constant dense<0.000000e+00> : vector<16xf32>
    %53 = vector.multi_reduction <add>, %52, %cst_21 [1] : vector<16x16xf32> to vector<16xf32>
    %54 = vector.shape_cast %53 : vector<16xf32> to vector<16x1xf32>
    %55 = tpu.reciprocal %54 {approx = true} : vector<16x1xf32> -> vector<16x1xf32>
    %56 = vector.broadcast %55 : vector<16x1xf32> to vector<16x16xf32>
    %57 = arith.mulf %52, %56 : vector<16x16xf32>
    %cst_22 = arith.constant dense<0.000000e+00> : vector<16x32xf32>
    %58 = tpu.matmul %57, %43, %cst_22 {dimension_numbers = #tpu.dot_dimension_numbers<[1], [0], [0], [1], [0, 0, 1, 1], [], []>} : vector<16x16xf32>, vector<16x32xf32>, vector<16x32xf32> -> vector<16x32xf32>
    %59 = vector.extract_strided_slice %33 {offsets = [0, 32], sizes = [16, 32], strides = [1, 1]} : vector<32x64xf32> to vector<16x32xf32>
    %60 = vector.extract_strided_slice %34 {offsets = [0, 32], sizes = [16, 32], strides = [1, 1]} : vector<32x64xf32> to vector<16x32xf32>
    %61 = vector.extract_strided_slice %35 {offsets = [0, 32], sizes = [16, 32], strides = [1, 1]} : vector<32x64xf32> to vector<16x32xf32>
    %62 = tpu.transpose %60, [1, 0] : vector<16x32xf32> -> vector<32x16xf32>
    %cst_23 = arith.constant dense<0.000000e+00> : vector<16x16xf32>
    %63 = tpu.matmul %59, %62, %cst_23 {dimension_numbers = #tpu.dot_dimension_numbers<[1], [0], [0], [1], [0, 0, 1, 1], [], []>} : vector<16x32xf32>, vector<32x16xf32>, vector<16x16xf32> -> vector<16x16xf32>
    %64 = vector.broadcast %40 : vector<1x16xf32> to vector<16x16xf32>
    %65 = arith.addf %63, %64 : vector<16x16xf32>
    %cst_24 = arith.constant dense<0xFF800000> : vector<16xf32>
    %66 = vector.multi_reduction <maximumf>, %65, %cst_24 [1] : vector<16x16xf32> to vector<16xf32>
    %67 = vector.shape_cast %66 : vector<16xf32> to vector<16x1xf32>
    %68 = vector.broadcast %67 : vector<16x1xf32> to vector<16x16xf32>
    %69 = arith.subf %65, %68 : vector<16x16xf32>
    %70 = math.exp %69 : vector<16x16xf32>
    %cst_25 = arith.constant dense<0.000000e+00> : vector<16xf32>
    %71 = vector.multi_reduction <add>, %70, %cst_25 [1] : vector<16x16xf32> to vector<16xf32>
    %72 = vector.shape_cast %71 : vector<16xf32> to vector<16x1xf32>
    %73 = tpu.reciprocal %72 {approx = true} : vector<16x1xf32> -> vector<16x1xf32>
    %74 = vector.broadcast %73 : vector<16x1xf32> to vector<16x16xf32>
    %75 = arith.mulf %70, %74 : vector<16x16xf32>
    %cst_26 = arith.constant dense<0.000000e+00> : vector<16x32xf32>
    %76 = tpu.matmul %75, %61, %cst_26 {dimension_numbers = #tpu.dot_dimension_numbers<[1], [0], [0], [1], [0, 0, 1, 1], [], []>} : vector<16x16xf32>, vector<16x32xf32>, vector<16x32xf32> -> vector<16x32xf32>
    %77 = tpu.concatenate %58, %76 in 1 : vector<16x32xf32>, vector<16x32xf32> -> vector<16x64xf32>
    %78 = vector.extract_strided_slice %0 {offsets = [1, 0], sizes = [1, 16], strides = [1, 1]} : vector<2x16xf32> to vector<1x16xf32>
    %cst_27 = arith.constant 1.000000e+00 : f32
    %79 = vector.broadcast %cst_27 : f32 to vector<1x16xf32>
    %80 = arith.subf %79, %78 : vector<1x16xf32>
    %cst_28 = arith.constant -1.000000e+09 : f32
    %81 = vector.broadcast %cst_28 : f32 to vector<1x16xf32>
    %82 = arith.mulf %80, %81 : vector<1x16xf32>
    %83 = vector.extract_strided_slice %33 {offsets = [16, 0], sizes = [16, 32], strides = [1, 1]} : vector<32x64xf32> to vector<16x32xf32>
    %84 = vector.extract_strided_slice %34 {offsets = [16, 0], sizes = [16, 32], strides = [1, 1]} : vector<32x64xf32> to vector<16x32xf32>
    %85 = vector.extract_strided_slice %35 {offsets = [16, 0], sizes = [16, 32], strides = [1, 1]} : vector<32x64xf32> to vector<16x32xf32>
    %86 = tpu.transpose %84, [1, 0] : vector<16x32xf32> -> vector<32x16xf32>
    %cst_29 = arith.constant dense<0.000000e+00> : vector<16x16xf32>
    %87 = tpu.matmul %83, %86, %cst_29 {dimension_numbers = #tpu.dot_dimension_numbers<[1], [0], [0], [1], [0, 0, 1, 1], [], []>} : vector<16x32xf32>, vector<32x16xf32>, vector<16x16xf32> -> vector<16x16xf32>
    %88 = vector.broadcast %82 : vector<1x16xf32> to vector<16x16xf32>
    %89 = arith.addf %87, %88 : vector<16x16xf32>
    %cst_30 = arith.constant dense<0xFF800000> : vector<16xf32>
    %90 = vector.multi_reduction <maximumf>, %89, %cst_30 [1] : vector<16x16xf32> to vector<16xf32>
    %91 = vector.shape_cast %90 : vector<16xf32> to vector<16x1xf32>
    %92 = vector.broadcast %91 : vector<16x1xf32> to vector<16x16xf32>
    %93 = arith.subf %89, %92 : vector<16x16xf32>
    %94 = math.exp %93 : vector<16x16xf32>
    %cst_31 = arith.constant dense<0.000000e+00> : vector<16xf32>
    %95 = vector.multi_reduction <add>, %94, %cst_31 [1] : vector<16x16xf32> to vector<16xf32>
    %96 = vector.shape_cast %95 : vector<16xf32> to vector<16x1xf32>
    %97 = tpu.reciprocal %96 {approx = true} : vector<16x1xf32> -> vector<16x1xf32>
    %98 = vector.broadcast %97 : vector<16x1xf32> to vector<16x16xf32>
    %99 = arith.mulf %94, %98 : vector<16x16xf32>
    %cst_32 = arith.constant dense<0.000000e+00> : vector<16x32xf32>
    %100 = tpu.matmul %99, %85, %cst_32 {dimension_numbers = #tpu.dot_dimension_numbers<[1], [0], [0], [1], [0, 0, 1, 1], [], []>} : vector<16x16xf32>, vector<16x32xf32>, vector<16x32xf32> -> vector<16x32xf32>
    %101 = vector.extract_strided_slice %33 {offsets = [16, 32], sizes = [16, 32], strides = [1, 1]} : vector<32x64xf32> to vector<16x32xf32>
    %102 = vector.extract_strided_slice %34 {offsets = [16, 32], sizes = [16, 32], strides = [1, 1]} : vector<32x64xf32> to vector<16x32xf32>
    %103 = vector.extract_strided_slice %35 {offsets = [16, 32], sizes = [16, 32], strides = [1, 1]} : vector<32x64xf32> to vector<16x32xf32>
    %104 = tpu.transpose %102, [1, 0] : vector<16x32xf32> -> vector<32x16xf32>
    %cst_33 = arith.constant dense<0.000000e+00> : vector<16x16xf32>
    %105 = tpu.matmul %101, %104, %cst_33 {dimension_numbers = #tpu.dot_dimension_numbers<[1], [0], [0], [1], [0, 0, 1, 1], [], []>} : vector<16x32xf32>, vector<32x16xf32>, vector<16x16xf32> -> vector<16x16xf32>
    %106 = vector.broadcast %82 : vector<1x16xf32> to vector<16x16xf32>
    %107 = arith.addf %105, %106 : vector<16x16xf32>
    %cst_34 = arith.constant dense<0xFF800000> : vector<16xf32>
    %108 = vector.multi_reduction <maximumf>, %107, %cst_34 [1] : vector<16x16xf32> to vector<16xf32>
    %109 = vector.shape_cast %108 : vector<16xf32> to vector<16x1xf32>
    %110 = vector.broadcast %109 : vector<16x1xf32> to vector<16x16xf32>
    %111 = arith.subf %107, %110 : vector<16x16xf32>
    %112 = math.exp %111 : vector<16x16xf32>
    %cst_35 = arith.constant dense<0.000000e+00> : vector<16xf32>
    %113 = vector.multi_reduction <add>, %112, %cst_35 [1] : vector<16x16xf32> to vector<16xf32>
    %114 = vector.shape_cast %113 : vector<16xf32> to vector<16x1xf32>
    %115 = tpu.reciprocal %114 {approx = true} : vector<16x1xf32> -> vector<16x1xf32>
    %116 = vector.broadcast %115 : vector<16x1xf32> to vector<16x16xf32>
    %117 = arith.mulf %112, %116 : vector<16x16xf32>
    %cst_36 = arith.constant dense<0.000000e+00> : vector<16x32xf32>
    %118 = tpu.matmul %117, %103, %cst_36 {dimension_numbers = #tpu.dot_dimension_numbers<[1], [0], [0], [1], [0, 0, 1, 1], [], []>} : vector<16x16xf32>, vector<16x32xf32>, vector<16x32xf32> -> vector<16x32xf32>
    %119 = tpu.concatenate %100, %118 in 1 : vector<16x32xf32>, vector<16x32xf32> -> vector<16x64xf32>
    %120 = tpu.concatenate %77, %119 in 0 : vector<16x64xf32>, vector<16x64xf32> -> vector<32x64xf32>
    %c0_37 = arith.constant 0 : index
    %c0_38 = arith.constant 0 : index
    %121 = vector.load %arg7[%c0_37, %c0_38] : memref<64x64xf32, #tpu.memory_space<vmem>>, vector<64x64xf32>
    %cst_39 = arith.constant dense<0.000000e+00> : vector<32x64xf32>
    %122 = tpu.matmul %120, %121, %cst_39 {dimension_numbers = #tpu.dot_dimension_numbers<[1], [0], [0], [1], [0, 0, 1, 1], [], []>} : vector<32x64xf32>, vector<64x64xf32>, vector<32x64xf32> -> vector<32x64xf32>
    %c0_40 = arith.constant 0 : index
    %c0_41 = arith.constant 0 : index
    %123 = vector.load %arg8[%c0_40, %c0_41] : memref<1x64xf32, #tpu.memory_space<vmem>>, vector<1x64xf32>
    %124 = vector.broadcast %123 : vector<1x64xf32> to vector<32x64xf32>
    %125 = arith.addf %122, %124 : vector<32x64xf32>
    %126 = arith.addf %25, %125 : vector<32x64xf32>
    %c0_42 = arith.constant 0 : index
    %c0_43 = arith.constant 0 : index
    %127 = vector.load %arg9[%c0_42, %c0_43] : memref<1x64xf32, #tpu.memory_space<vmem>>, vector<1x64xf32>
    %c0_44 = arith.constant 0 : index
    %c0_45 = arith.constant 0 : index
    %128 = vector.load %arg10[%c0_44, %c0_45] : memref<1x64xf32, #tpu.memory_space<vmem>>, vector<1x64xf32>
    %cst_46 = arith.constant dense<0.000000e+00> : vector<32xf32>
    %129 = vector.multi_reduction <add>, %126, %cst_46 [1] : vector<32x64xf32> to vector<32xf32>
    %130 = vector.shape_cast %129 : vector<32xf32> to vector<32x1xf32>
    %cst_47 = arith.constant 6.400000e+01 : f32
    %131 = vector.broadcast %cst_47 : f32 to vector<32x1xf32>
    %132 = arith.divf %130, %131 : vector<32x1xf32>
    %133 = vector.broadcast %132 : vector<32x1xf32> to vector<32x64xf32>
    %134 = arith.subf %126, %133 : vector<32x64xf32>
    %135 = arith.mulf %134, %134 : vector<32x64xf32>
    %cst_48 = arith.constant dense<0.000000e+00> : vector<32xf32>
    %136 = vector.multi_reduction <add>, %135, %cst_48 [1] : vector<32x64xf32> to vector<32xf32>
    %137 = vector.shape_cast %136 : vector<32xf32> to vector<32x1xf32>
    %cst_49 = arith.constant 6.400000e+01 : f32
    %138 = vector.broadcast %cst_49 : f32 to vector<32x1xf32>
    %139 = arith.divf %137, %138 : vector<32x1xf32>
    %140 = vector.broadcast %132 : vector<32x1xf32> to vector<32x64xf32>
    %141 = arith.subf %126, %140 : vector<32x64xf32>
    %cst_50 = arith.constant 9.99999996E-13 : f32
    %142 = vector.broadcast %cst_50 : f32 to vector<32x1xf32>
    %143 = arith.addf %139, %142 : vector<32x1xf32>
    %144 = math.rsqrt %143 : vector<32x1xf32>
    %145 = vector.broadcast %144 : vector<32x1xf32> to vector<32x64xf32>
    %146 = arith.mulf %141, %145 : vector<32x64xf32>
    %147 = vector.broadcast %127 : vector<1x64xf32> to vector<32x64xf32>
    %148 = arith.mulf %146, %147 : vector<32x64xf32>
    %149 = vector.broadcast %128 : vector<1x64xf32> to vector<32x64xf32>
    %150 = arith.addf %148, %149 : vector<32x64xf32>
    %c0_51 = arith.constant 0 : index
    %c0_52 = arith.constant 0 : index
    %151 = vector.load %arg11[%c0_51, %c0_52] : memref<64x128xf32, #tpu.memory_space<vmem>>, vector<64x128xf32>
    %cst_53 = arith.constant dense<0.000000e+00> : vector<32x128xf32>
    %152 = tpu.matmul %150, %151, %cst_53 {dimension_numbers = #tpu.dot_dimension_numbers<[1], [0], [0], [1], [0, 0, 1, 1], [], []>} : vector<32x64xf32>, vector<64x128xf32>, vector<32x128xf32> -> vector<32x128xf32>
    %c0_54 = arith.constant 0 : index
    %c0_55 = arith.constant 0 : index
    %153 = vector.load %arg12[%c0_54, %c0_55] : memref<1x128xf32, #tpu.memory_space<vmem>>, vector<1x128xf32>
    %154 = vector.broadcast %153 : vector<1x128xf32> to vector<32x128xf32>
    %155 = arith.addf %152, %154 : vector<32x128xf32>
    %156 = arith.mulf %155, %155 : vector<32x128xf32>
    %157 = arith.mulf %155, %156 : vector<32x128xf32>
    %cst_56 = arith.constant 4.471500e-02 : f32
    %158 = vector.broadcast %cst_56 : f32 to vector<32x128xf32>
    %159 = arith.mulf %158, %157 : vector<32x128xf32>
    %160 = arith.addf %155, %159 : vector<32x128xf32>
    %cst_57 = arith.constant 0.797884583 : f32
    %161 = vector.broadcast %cst_57 : f32 to vector<32x128xf32>
    %162 = arith.mulf %161, %160 : vector<32x128xf32>
    %163 = math.tanh %162 : vector<32x128xf32>
    %cst_58 = arith.constant 1.000000e+00 : f32
    %164 = vector.broadcast %cst_58 : f32 to vector<32x128xf32>
    %165 = arith.addf %164, %163 : vector<32x128xf32>
    %cst_59 = arith.constant 5.000000e-01 : f32
    %166 = vector.broadcast %cst_59 : f32 to vector<32x128xf32>
    %167 = arith.mulf %166, %165 : vector<32x128xf32>
    %168 = arith.mulf %155, %167 : vector<32x128xf32>
    %c0_60 = arith.constant 0 : index
    %c0_61 = arith.constant 0 : index
    %169 = vector.load %arg13[%c0_60, %c0_61] : memref<128x64xf32, #tpu.memory_space<vmem>>, vector<128x64xf32>
    %cst_62 = arith.constant dense<0.000000e+00> : vector<32x64xf32>
    %170 = tpu.matmul %168, %169, %cst_62 {dimension_numbers = #tpu.dot_dimension_numbers<[1], [0], [0], [1], [0, 0, 1, 1], [], []>} : vector<32x128xf32>, vector<128x64xf32>, vector<32x64xf32> -> vector<32x64xf32>
    %c0_63 = arith.constant 0 : index
    %c0_64 = arith.constant 0 : index
    %171 = vector.load %arg14[%c0_63, %c0_64] : memref<1x64xf32, #tpu.memory_space<vmem>>, vector<1x64xf32>
    %172 = vector.broadcast %171 : vector<1x64xf32> to vector<32x64xf32>
    %173 = arith.addf %170, %172 : vector<32x64xf32>
    %174 = arith.addf %150, %173 : vector<32x64xf32>
    %c0_65 = arith.constant 0 : index
    %c0_66 = arith.constant 0 : index
    %175 = vector.load %arg15[%c0_65, %c0_66] : memref<1x64xf32, #tpu.memory_space<vmem>>, vector<1x64xf32>
    %c0_67 = arith.constant 0 : index
    %c0_68 = arith.constant 0 : index
    %176 = vector.load %arg16[%c0_67, %c0_68] : memref<1x64xf32, #tpu.memory_space<vmem>>, vector<1x64xf32>
    %cst_69 = arith.constant dense<0.000000e+00> : vector<32xf32>
    %177 = vector.multi_reduction <add>, %174, %cst_69 [1] : vector<32x64xf32> to vector<32xf32>
    %178 = vector.shape_cast %177 : vector<32xf32> to vector<32x1xf32>
    %cst_70 = arith.constant 6.400000e+01 : f32
    %179 = vector.broadcast %cst_70 : f32 to vector<32x1xf32>
    %180 = arith.divf %178, %179 : vector<32x1xf32>
    %181 = vector.broadcast %180 : vector<32x1xf32> to vector<32x64xf32>
    %182 = arith.subf %174, %181 : vector<32x64xf32>
    %183 = arith.mulf %182, %182 : vector<32x64xf32>
    %cst_71 = arith.constant dense<0.000000e+00> : vector<32xf32>
    %184 = vector.multi_reduction <add>, %183, %cst_71 [1] : vector<32x64xf32> to vector<32xf32>
    %185 = vector.shape_cast %184 : vector<32xf32> to vector<32x1xf32>
    %cst_72 = arith.constant 6.400000e+01 : f32
    %186 = vector.broadcast %cst_72 : f32 to vector<32x1xf32>
    %187 = arith.divf %185, %186 : vector<32x1xf32>
    %188 = vector.broadcast %180 : vector<32x1xf32> to vector<32x64xf32>
    %189 = arith.subf %174, %188 : vector<32x64xf32>
    %cst_73 = arith.constant 9.99999996E-13 : f32
    %190 = vector.broadcast %cst_73 : f32 to vector<32x1xf32>
    %191 = arith.addf %187, %190 : vector<32x1xf32>
    %192 = math.rsqrt %191 : vector<32x1xf32>
    %193 = vector.broadcast %192 : vector<32x1xf32> to vector<32x64xf32>
    %194 = arith.mulf %189, %193 : vector<32x64xf32>
    %195 = vector.broadcast %175 : vector<1x64xf32> to vector<32x64xf32>
    %196 = arith.mulf %194, %195 : vector<32x64xf32>
    %197 = vector.broadcast %176 : vector<1x64xf32> to vector<32x64xf32>
    %198 = arith.addf %196, %197 : vector<32x64xf32>
    %199 = vector.extract_strided_slice %0 {offsets = [0, 0], sizes = [1, 16], strides = [1, 1]} : vector<2x16xf32> to vector<1x16xf32>
    %200 = vector.extract_strided_slice %198 {offsets = [0, 0], sizes = [16, 64], strides = [1, 1]} : vector<32x64xf32> to vector<16x64xf32>
    %cst_74 = arith.constant dense<0.000000e+00> : vector<1x64xf32>
    %201 = tpu.matmul %199, %200, %cst_74 {dimension_numbers = #tpu.dot_dimension_numbers<[1], [0], [0], [1], [0, 0, 1, 1], [], []>} : vector<1x16xf32>, vector<16x64xf32>, vector<1x64xf32> -> vector<1x64xf32>
    %cst_75 = arith.constant dense<0.000000e+00> : vector<1xf32>
    %202 = vector.multi_reduction <add>, %199, %cst_75 [1] : vector<1x16xf32> to vector<1xf32>
    %203 = vector.shape_cast %202 : vector<1xf32> to vector<1x1xf32>
    %cst_76 = arith.constant 9.99999971E-10 : f32
    %204 = vector.broadcast %cst_76 : f32 to vector<1x1xf32>
    %205 = arith.maximumf %203, %204 : vector<1x1xf32>
    %206 = vector.broadcast %205 : vector<1x1xf32> to vector<1x64xf32>
    %207 = arith.divf %201, %206 : vector<1x64xf32>
    %208 = vector.extract_strided_slice %0 {offsets = [1, 0], sizes = [1, 16], strides = [1, 1]} : vector<2x16xf32> to vector<1x16xf32>
    %209 = vector.extract_strided_slice %198 {offsets = [16, 0], sizes = [16, 64], strides = [1, 1]} : vector<32x64xf32> to vector<16x64xf32>
    %cst_77 = arith.constant dense<0.000000e+00> : vector<1x64xf32>
    %210 = tpu.matmul %208, %209, %cst_77 {dimension_numbers = #tpu.dot_dimension_numbers<[1], [0], [0], [1], [0, 0, 1, 1], [], []>} : vector<1x16xf32>, vector<16x64xf32>, vector<1x64xf32> -> vector<1x64xf32>
    %cst_78 = arith.constant dense<0.000000e+00> : vector<1xf32>
    %211 = vector.multi_reduction <add>, %208, %cst_78 [1] : vector<1x16xf32> to vector<1xf32>
    %212 = vector.shape_cast %211 : vector<1xf32> to vector<1x1xf32>
    %cst_79 = arith.constant 9.99999971E-10 : f32
    %213 = vector.broadcast %cst_79 : f32 to vector<1x1xf32>
    %214 = arith.maximumf %212, %213 : vector<1x1xf32>
    %215 = vector.broadcast %214 : vector<1x1xf32> to vector<1x64xf32>
    %216 = arith.divf %210, %215 : vector<1x64xf32>
    %cst_80 = arith.constant 0.000000e+00 : f32
    %217 = vector.broadcast %cst_80 : f32 to vector<6x64xf32>
    %218 = tpu.concatenate %207, %216, %217 in 0 : vector<1x64xf32>, vector<1x64xf32>, vector<6x64xf32> -> vector<8x64xf32>
    %c0_81 = arith.constant 0 : index
    %c0_82 = arith.constant 0 : index
    %219 = vector.load %arg17[%c0_81, %c0_82] : memref<64x128xf32, #tpu.memory_space<vmem>>, vector<64x128xf32>
    %cst_83 = arith.constant dense<0.000000e+00> : vector<8x128xf32>
    %220 = tpu.matmul %218, %219, %cst_83 {dimension_numbers = #tpu.dot_dimension_numbers<[1], [0], [0], [1], [0, 0, 1, 1], [], []>} : vector<8x64xf32>, vector<64x128xf32>, vector<8x128xf32> -> vector<8x128xf32>
    %c0_84 = arith.constant 0 : index
    %c0_85 = arith.constant 0 : index
    %221 = vector.load %arg18[%c0_84, %c0_85] : memref<1x128xf32, #tpu.memory_space<vmem>>, vector<1x128xf32>
    %222 = vector.broadcast %221 : vector<1x128xf32> to vector<8x128xf32>
    %223 = arith.addf %220, %222 : vector<8x128xf32>
    %c0_86 = arith.constant 0 : index
    %c0_87 = arith.constant 0 : index
    %224 = vector.load %arg19[%c0_86, %c0_87] : memref<8x128xf32, #tpu.memory_space<vmem>>, vector<8x128xf32>
    tpu.vector_store %arg19[%c0_86, %c0_87], %223 {strides = array<i32>} : memref<8x128xf32, #tpu.memory_space<vmem>>, vector<8x128xf32>,
    return
  }
  func.func @transform_0(%arg0: i32) -> (i32, i32) {
    %c0_i32 = arith.constant 0 : i32
    %c0_i32_0 = arith.constant 0 : i32
    %c0_i32_1 = arith.constant 0 : i32
    return %c0_i32, %c0_i32_0 : i32, i32
  }
  func.func @transform_1(%arg0: i32) -> (i32, i32) {
    %c0_i32 = arith.constant 0 : i32
    %c0_i32_0 = arith.constant 0 : i32
    %c0_i32_1 = arith.constant 0 : i32
    return %c0_i32, %c0_i32_0 : i32, i32
  }
  func.func @transform_2(%arg0: i32) -> (i32, i32) {
    %c0_i32 = arith.constant 0 : i32
    %c0_i32_0 = arith.constant 0 : i32
    %c0_i32_1 = arith.constant 0 : i32
    return %c0_i32, %c0_i32_0 : i32, i32
  }
  func.func @transform_3(%arg0: i32) -> (i32, i32) {
    %c0_i32 = arith.constant 0 : i32
    %c0_i32_0 = arith.constant 0 : i32
    %c0_i32_1 = arith.constant 0 : i32
    return %c0_i32, %c0_i32_0 : i32, i32
  }
  func.func @transform_4(%arg0: i32) -> (i32, i32) {
    %c0_i32 = arith.constant 0 : i32
    %c0_i32_0 = arith.constant 0 : i32
    %c0_i32_1 = arith.constant 0 : i32
    return %c0_i32, %c0_i32_0 : i32, i32
  }
  func.func @transform_5(%arg0: i32) -> (i32, i32) {
    %c0_i32 = arith.constant 0 : i32
    %c0_i32_0 = arith.constant 0 : i32
    %c0_i32_1 = arith.constant 0 : i32
    return %c0_i32, %c0_i32_0 : i32, i32
  }
  func.func @transform_6(%arg0: i32) -> (i32, i32) {
    %c0_i32 = arith.constant 0 : i32
    %c0_i32_0 = arith.constant 0 : i32
    %c0_i32_1 = arith.constant 0 : i32
    return %c0_i32, %c0_i32_0 : i32, i32
  }
  func.func @transform_7(%arg0: i32) -> (i32, i32) {
    %c0_i32 = arith.constant 0 : i32
    %c0_i32_0 = arith.constant 0 : i32
    %c0_i32_1 = arith.constant 0 : i32
    return %c0_i32, %c0_i32_0 : i32, i32
  }
  func.func @transform_8(%arg0: i32) -> (i32, i32) {
    %c0_i32 = arith.constant 0 : i32
    %c0_i32_0 = arith.constant 0 : i32
    %c0_i32_1 = arith.constant 0 : i32
    return %c0_i32, %c0_i32_0 : i32, i32
  }
  func.func @transform_9(%arg0: i32) -> (i32, i32) {
    %c0_i32 = arith.constant 0 : i32
    %c0_i32_0 = arith.constant 0 : i32
    %c0_i32_1 = arith.constant 0 : i32
    return %c0_i32, %c0_i32_0 : i32, i32
  }
  func.func @transform_10(%arg0: i32) -> (i32, i32) {
    %c0_i32 = arith.constant 0 : i32
    %c0_i32_0 = arith.constant 0 : i32
    %c0_i32_1 = arith.constant 0 : i32
    return %c0_i32, %c0_i32_0 : i32, i32
  }
  func.func @transform_11(%arg0: i32) -> (i32, i32) {
    %c0_i32 = arith.constant 0 : i32
    %c0_i32_0 = arith.constant 0 : i32
    %c0_i32_1 = arith.constant 0 : i32
    return %c0_i32, %c0_i32_0 : i32, i32
  }
  func.func @transform_12(%arg0: i32) -> (i32, i32) {
    %c0_i32 = arith.constant 0 : i32
    %c0_i32_0 = arith.constant 0 : i32
    %c0_i32_1 = arith.constant 0 : i32
    return %c0_i32, %c0_i32_0 : i32, i32
  }
  func.func @transform_13(%arg0: i32) -> (i32, i32) {
    %c0_i32 = arith.constant 0 : i32
    %c0_i32_0 = arith.constant 0 : i32
    %c0_i32_1 = arith.constant 0 : i32
    return %c0_i32, %c0_i32_0 : i32, i32
  }
  func.func @transform_14(%arg0: i32) -> (i32, i32) {
    %c0_i32 = arith.constant 0 : i32
    %c0_i32_0 = arith.constant 0 : i32
    %c0_i32_1 = arith.constant 0 : i32
    return %c0_i32, %c0_i32_0 : i32, i32
  }
  func.func @transform_15(%arg0: i32) -> (i32, i32) {
    %c0_i32 = arith.constant 0 : i32
    %c0_i32_0 = arith.constant 0 : i32
    %c0_i32_1 = arith.constant 0 : i32
    return %c0_i32, %c0_i32_0 : i32, i32
  }
  func.func @transform_16(%arg0: i32) -> (i32, i32) {
    %c0_i32 = arith.constant 0 : i32
    %c0_i32_0 = arith.constant 0 : i32
    %c0_i32_1 = arith.constant 0 : i32
    return %c0_i32, %c0_i32_0 : i32, i32
  }
  func.func @transform_17(%arg0: i32) -> (i32, i32) {
    %c0_i32 = arith.constant 0 : i32
    %c0_i32_0 = arith.constant 0 : i32
    %c0_i32_1 = arith.constant 0 : i32
    return %c0_i32, %c0_i32_0 : i32, i32
  }
  func.func @transform_18(%arg0: i32) -> (i32, i32) {
    %c0_i32 = arith.constant 0 : i32
    %c0_i32_0 = arith.constant 0 : i32
    %c0_i32_1 = arith.constant 0 : i32
    return %c0_i32, %c0_i32_0 : i32, i32
  }
}

</mosaic_0001>

<bundles_post_ra>
// kernel: onnx_setfit_forward.1
= control target key start
LH: loop header
LB: loop body
LE: loop exit
PB: predicated region body
PF: predicated region fallthrough
CT: control target
= control target key end

     0   :  { %vm66_vm0 = vcmask 523264   ;;  %v2438_v33 = vmov 0.0   ;;  %vm285_vm1 = vcmask 261120   ;;  %vm371_vm3 = vcmask 130048   ;;  %s2440_s22 = smov 32   ;;  %s3060_s0 = inlined_call_operand.vmem [shape: f32[32,64], index: 0, kind: input, shape index: {}]   ;;  %s3061_s4 = inlined_call_operand.vmem [shape: f32[64,192], index: 4, kind: input, shape index: {}]   ;;  %s3062_s2 = inlined_call_operand.vmem [shape: f32[1,64], index: 2, kind: input, shape index: {}]   ;;  %s3063_s3 = inlined_call_operand.vmem [shape: f32[1,64], index: 3, kind: input, shape index: {}]   ;;  %s3064_s5 = inlined_call_operand.vmem [shape: f32[1,192], index: 5, kind: input, shape index: {}]   ;;  %s3065_s1 = inlined_call_operand.vmem [shape: f32[2,16], index: 1, kind: input, shape index: {}]   ;;  %s3066_s6 = inlined_call_operand.vmem [shape: f32[64,64], index: 6, kind: input, shape index: {}]   ;;  %s3067_s7 = inlined_call_operand.vmem [shape: f32[1,64], index: 7, kind: input, shape index: {}]   ;;  %s3068_s10 = inlined_call_operand.vmem [shape: f32[64,128], index: 10, kind: input, shape index: {}]   ;;  %s3069_s8 = inlined_call_operand.vmem [shape: f32[1,64], index: 8, kind: input, shape index: {}]   ;;  %s3070_s9 = inlined_call_operand.vmem [shape: f32[1,64], index: 9, kind: input, shape index: {}]   ;;  %s3071_s12 = inlined_call_operand.vmem [shape: f32[128,64], index: 12, kind: input, shape index: {}]   ;;  %s3072_s11 = inlined_call_operand.vmem [shape: f32[1,128], index: 11, kind: input, shape index: {}]   ;;  %s3073_s13 = inlined_call_operand.vmem [shape: f32[1,64], index: 13, kind: input, shape index: {}]   ;;  %s3074_s14 = inlined_call_operand.vmem [shape: f32[1,64], index: 14, kind: input, shape index: {}]   ;;  %s3075_s15 = inlined_call_operand.vmem [shape: f32[1,64], index: 15, kind: input, shape index: {}]   ;;  %s3076_s16 = inlined_call_operand.vmem [shape: f32[64,128], index: 16, kind: input, shape index: {}]   ;;  %s3077_s17 = inlined_call_operand.vmem [shape: f32[1,128], index: 17, kind: input, shape index: {}]   ;;  %s3078_s18 = inlined_call_operand.vmem [shape: f32[8,128], index: 18, kind: output, shape index: {}]  }
   0x1   :  { %3081 = sst [smem:[#allocation2_spill]] %s3060_s0  ;;  %244 = vmatprep.mubr.f32.mxu0 %v2438_v33  ;;  %v2623_v52 = vld [vmem:[%s3063_s3] ss:$0 sm:$0xff]  ;;  %vm2684_vm2 = vmpackc.low %vm285_vm1, %vm285_vm1  ;;  %vm2443_vm4 = vmmov 0   ;;  %vm1774_vm5 = vcmask 123905   ;;  %vm1694_vm6 = vcmask 122880  }
   0x2   :  { %3082 = sst [smem:[#allocation3_spill]] %s3061_s4  ;;  %s3084_s29 = sld [smem:[#allocation2_spill]]  ;;  %vm1787_vm7 = vcmask 1040384   ;;  %vm1789_vm8 = vcmask 1041408  }
   0x3   :  { %3083 = sst [smem:[#allocation4_spill]] %s3062_s2  ;;  %s3085_s20 = sld [smem:[#allocation3_spill]] }
   0x4   :  { %s3086_s30 = sld [smem:[#allocation4_spill]]  ;;  %s2441_s2 = smov 96  }
   0x8   :  { %v60_v0 = vld [vmem:[%s3084_s29] sm:$0xff]  ;;  %v61_v1 = vld [vmem:[%s3084_s29 + $0x8] sm:$0xff]  ;;  %v62_v39 = vld [vmem:[%s3084_s29 + $0x10] sm:$0xff] }
   0x9   :  { %v67_v2 = vsel %vm66_vm0, %v60_v0, 0.0  ;;  %v70_v3 = vsel %vm66_vm0, %v61_v1, 0.0  ;;  %v141_v14 = vld [vmem:[%s3085_s20 + $0x8] sm:$0xff]  ;;  %v143_v15 = vld [vmem:[%s3085_s20 + $0x18] sm:$0xff]  ;;  %v140_v17 = vld [vmem:[%s3085_s20] sm:$0xff]  ;;  %v73_v41 = vsel %vm66_vm0, %v62_v39, 0.0 }
   0xa   :  { %68 = vadd.xlane.f32.xlu0 %v67_v2  ;;  %v2195_v16 = vpack.c.bf16 %v143_v15, %v141_v14  ;;  %v142_v18 = vld [vmem:[%s3085_s20 + $0x10] sm:$0xff]  ;;  %v145_v20 = vld [vmem:[%s3085_s20 + $0x28] sm:$0xff]  ;;  %v147_v21 = vld [vmem:[%s3085_s20 + $0x38] sm:$0xff] }
   0xb   :  { %v2197_v19 = vpack.c.bf16 %v142_v18, %v140_v17  ;;  %v2199_v22 = vpack.c.bf16 %v147_v21, %v145_v20  ;;  %v144_v23 = vld [vmem:[%s3085_s20 + $0x20] sm:$0xff]  ;;  %v146_v24 = vld [vmem:[%s3085_s20 + $0x30] sm:$0xff]  ;;  %v149_v26 = vld [vmem:[%s3085_s20 + $0x48] sm:$0xff] }
   0xc   :  { %2196 = vmatprep.subr.bf16.mxu0 %v2195_v16  ;;  %v2201_v25 = vpack.c.bf16 %v146_v24, %v144_v23  ;;  %v151_v27 = vld [vmem:[%s3085_s20 + $0x58] sm:$0xff]  ;;  %v148_v28 = vld [vmem:[%s3085_s20 + $0x40] sm:$0xff]  ;;  %v150_v30 = vld [vmem:[%s3085_s20 + $0x50] sm:$0xff] }
   0xd   :  { %2198 = vmatpush1.bf16.msra.mxu0 %v2197_v19  ;;  %v2203_v29 = vpack.c.bf16 %v151_v27, %v149_v26  ;;  %v153_v31 = vld [vmem:[%s3085_s20 + $0x68] sm:$0xff]  ;;  %v155_v32 = vld [vmem:[%s3085_s20 + $0x78] sm:$0xff]  ;;  %v2205_v34 = vpack.c.bf16 %v150_v30, %v148_v28  ;;  %v152_v36 = vld [vmem:[%s3085_s20 + $0x60] sm:$0xff] }
   0xe   :  { %71 = vadd.xlane.f32.xlu0 %v70_v3  ;;  %2200 = vmatprep.subr.bf16.mxu0 %v2199_v22  ;;  %v2207_v35 = vpack.c.bf16 %v155_v32, %v153_v31  ;;  %v154_v37 = vld [vmem:[%s3085_s20 + $0x70] sm:$0xff]  ;;  %v63_v40 = vld [vmem:[%s3084_s29 + $0x18] sm:$0xff]  ;;  %v2617_v50 = vld [vmem:[%s3086_s30] ss:$0 sm:$0xff] }
   0xf   :  { %v2209_v38 = vpack.c.bf16 %v154_v37, %v152_v36  ;;  %v76_v42 = vsel %vm66_vm0, %v63_v40, 0.0 }
  0x11   :  { %2202 = vmatpush1.bf16.msra.mxu0 %v2201_v25 }
  0x12   :  { %2204 = vmatprep.subr.bf16.mxu0 %v2203_v29 }
  0x15   :  { %2206 = vmatpush1.bf16.msra.mxu0 %v2205_v34 }
  0x16   :  { %2208 = vmatprep.subr.bf16.mxu0 %v2207_v35 }
  0x19   :  { %2210 = vmatpush1.bf16.msra.mxu0 %v2209_v38 }
  0x97   :  { %v69_v4 = vpop.xlane.xlu0 %68 }
  0x98   :  { %v80_v5 = vmul.f32 0.015625, %v69_v4 }
  0x9a   :  { %v2547_v6 = vsub.f32 %v60_v0, %v80_v5  ;;  %v158_v5 = vlaneseq }
  0x9b   :  { %v72_v7 = vpop.xlane.xlu0 %71 }
  0x9c   :  { %v81_v8 = vmul.f32 0.015625, %v72_v7  ;;  %v88_v9 = vmul.f32 %v2547_v6, %v2547_v6 }
  0x9e   :  { %v2551_v10 = vsub.f32 %v61_v1, %v81_v8  ;;  %v92_v11 = vsel %vm66_vm0, %v88_v9, 0.0  ;;  %v156_v8 = vld [vmem:[%s3064_s5] sm:$0x3]  ;;  %s2439_s5 = smov 64  }
  0x9f   :  { %93 = vadd.xlane.f32.xlu1 %v92_v11 }
  0xa0   :  { %v89_v12 = vmul.f32 %v2551_v10, %v2551_v10 }
  0xa2   :  { %v95_v13 = vsel %vm66_vm0, %v89_v12, 0.0 }
  0xa3   :  { %96 = vadd.xlane.f32.xlu1 %v95_v13 }
  0xa7   :  { %74 = vadd.xlane.f32.xlu1 %v73_v41 }
  0xab   :  { %77 = vadd.xlane.f32.xlu1 %v76_v42 }
 0x12c   :  { %v94_v43 = vpop.xlane.xlu1 %93 }
 0x12d   :  { %v104_v44 = vmul.f32 0.015625, %v94_v43 }
 0x12f   :  { %v108_v45 = vadd.f32 1e-12, %v104_v44 }
 0x130   :  { %v97_v46 = vpop.xlane.xlu1 %96 }
 0x131   :  { %2369 = vrsqrt.f32 %v108_v45  ;;  %v105_v47 = vmul.f32 0.015625, %v97_v46 }
 0x133   :  { %v109_v48 = vadd.f32 1e-12, %v105_v47 }
 0x134   :  { %v75_v59 = vpop.xlane.xlu1 %74 }
 0x135   :  { %2371 = vrsqrt.f32 %v109_v48  ;;  %v82_v60 = vmul.f32 0.015625, %v75_v59  ;;  %v2715_v59 = vld [vmem:[%s3065_s1] sm:$0x3] }
 0x137   :  { %v86_v61 = vsub.f32 %v62_v39, %v82_v60  ;;  %v273_v60 = vsub.f32 1.0, %v2715_v59 }
 0x138   :  { %v78_v62 = vpop.xlane.xlu1 %77 }
 0x139   :  { %v83_v63 = vmul.f32 0.015625, %v78_v62  ;;  %v90_v0 = vmul.f32 %v86_v61, %v86_v61 }
 0x13b   :  { %v2370_v49 = vpop.eup %2369  ;;  %v87_v1 = vsub.f32 %v63_v40, %v83_v63  ;;  %v98_v2 = vsel %vm66_vm0, %v90_v0, 0.0 }
 0x13c   :  { %v116_v51 = vmul.f32 %v2370_v49, %v2547_v6  ;;  %99 = vadd.xlane.f32.xlu1 %v98_v2  ;;  %v2642_v6 = vshrl.u32 %v158_v5, 7 }
 0x13d   :  { %v91_v3 = vmul.f32 %v87_v1, %v87_v1 }
 0x13e   :  { %v126_v53 = vmul.f32 %v2617_v50, %v116_v51  ;;  %v160_v7 = vsub.s32 0, %v2642_v6 }
 0x13f   :  { %v2372_v54 = vpop.eup %2371  ;;  %v101_v4 = vsel %vm66_vm0, %v91_v3, 0.0 }
 0x140   :  { %v2627_v55 = vadd.f32 %v2623_v52, %v126_v53  ;;  %v117_v56 = vmul.f32 %v2372_v54, %v2551_v10  ;;  %102 = vadd.xlane.f32.xlu1 %v101_v4  ;;  %v161_v9 = vrot.slane %v156_v8, %v160_v7  ;;  %v164_v10 = vsub.s32 1, %v2642_v6 }
 0x142   :  { %1886 = vmatmul.mubr.msk.f32.vlgmr.msra.gmra.mrb[0].mxu0 %vm66_vm0, %v2627_v55  ;;  %v127_v57 = vmul.f32 %v2617_v50, %v117_v56  ;;  %v165_v14 = vrot.slane %v156_v8, %v164_v10 }
 0x143   :  { %250 = vmatprep.mubr.f32.mxu0 %v2438_v33 }
 0x144   :  { %v2635_v58 = vadd.f32 %v2623_v52, %v127_v57 }
 0x146   :  { %1887 = vmatmul.mubr.msk.f32.gmra.mrb[2].mxu0 %vm66_vm0, %v2635_v58 }
 0x147   :  { %256 = vmatprep.mubr.f32.mxu0 %v2438_v33 }
 0x1c9   :  { %v100_v24 = vpop.xlane.xlu1 %99 }
 0x1ca   :  { %v106_v25 = vmul.f32 0.015625, %v100_v24 }
 0x1cc   :  { %v110_v26 = vadd.f32 1e-12, %v106_v25 }
 0x1cd   :  { %v103_v27 = vpop.xlane.xlu1 %102 }
 0x1ce   :  { %2373 = vrsqrt.f32 %v110_v26  ;;  %v107_v28 = vmul.f32 0.015625, %v103_v27 }
 0x1d0   :  { %v111_v29 = vadd.f32 1e-12, %v107_v28 }
 0x1d2   :  { %2375 = vrsqrt.f32 %v111_v29 }
 0x1d8   :  { %v2374_v30 = vpop.eup %2373 }
 0x1d9   :  { %v118_v31 = vmul.f32 %v2374_v30, %v86_v61  ;;  %v2718_v61 = vmul.f32 -1e+09, %v273_v60 }
 0x1db   :  { %v128_v32 = vmul.f32 %v2617_v50, %v118_v31  ;;  %v2723_v62 = vrot.slane %v2718_v61, %v160_v7 }
 0x1dc   :  { %v2376_v34 = vpop.eup %2375 }
 0x1dd   :  { %v2671_v35 = vadd.f32 %v2623_v52, %v128_v32  ;;  %v119_v36 = vmul.f32 %v2376_v34, %v87_v1 }
 0x1df   :  { %1888 = vmatmul.mubr.msk.f32.gmra.mrb[4].mxu0 %vm66_vm0, %v2671_v35  ;;  %v129_v37 = vmul.f32 %v2617_v50, %v119_v36 }
 0x1e0   :  { %262 = vmatprep.mubr.f32.mxu0 %v2438_v33 }
 0x1e1   :  { %v2678_v38 = vadd.f32 %v2623_v52, %v129_v37 }
 0x1e3   :  { %1889 = vmatmul.mubr.msk.f32.gmra.mrb[6].mxu0 %vm66_vm0, %v2678_v38 }
 0x215   :  { %v246_v11 = vpop.f32.mrb[0].mxu0 }
 0x216   :  { %v247_v12 = vadd.f32 %v246_v11, %v161_v9  ;;  %v248_v13 = vpop.f32.mrb[1].mxu0 }
 0x217   :  { %v2657_v19 = vadd.f32 %v248_v13, %v165_v14 }
 0x218   :  { %v2653_v15 = vmul.f32 0.17677669, %v247_v12 }
 0x219   :  { %v252_v16 = vpop.f32.mrb[2].mxu0 }
 0x21a   :  { %v253_v17 = vadd.f32 %v252_v16, %v161_v9  ;;  %v254_v18 = vpop.f32.mrb[3].mxu0  ;;  %2028 = vmatprep.mubr.msk.f32.mxu1 %vm285_vm1, %v2653_v15 }
 0x21b   :  { %v2659_v20 = vadd.f32 %v254_v18, %v165_v14 }
 0x21c   :  { %v2661_v21 = vpack.i.bf16 %v253_v17, %v247_v12  ;;  %v270_v44 = vmul.f32 0.17677669, %v253_v17 }
 0x21d   :  { %v2354_v22 = vpack.i.bf16 %v2659_v20, %v2657_v19  ;;  %v2217_v23 = vpack.c.bf16 %v2659_v20, %v2657_v19 }
 0x21e   :  { %2340 = vrot.lane.b32.xlu0 %v2661_v21, %s2439_s5 }
 0x290   :  { %v2341_v39 = vpop.permute.xlu0 %2340 }
 0x291   :  { %v2343_v40 = vunpack.i.h.bf16 %v2341_v39  ;;  %v2342_v41 = vunpack.i.l.bf16 %v2341_v39 }
 0x293   :  { %v2211_v43 = vpack.c.bf16 %v2343_v40, %v2342_v41 }
 0x295   :  { %2213 = vmatprep.subr.msk.bf16.mxu1 %vm2684_vm2, %v2211_v43 }
 0x296   :  { %2216 = vmatpush3.bf16.xpose.msk.msra.mxu1 %vm2684_vm2, %v2211_v43 }
 0x297   :  { %2218 = vmatprep.subr.bf16.mxu1 %v2217_v23 }
 0x29d   :  { %2029 = vmatmul.mubr.msk.f32.vlgmr.msra.gmra.mrb[0].mxu1 %vm285_vm1, %v270_v44 }
 0x29e   :  { %2220 = vmatpush3.bf16.msra.mxu1 %v2217_v23 }
 0x2b2   :  { %v258_v45 = vpop.f32.mrb[4].mxu0 }
 0x2b3   :  { %v259_v46 = vadd.f32 %v258_v45, %v161_v9  ;;  %v260_v47 = vpop.f32.mrb[5].mxu0 }
 0x2b4   :  { %v2695_v49 = vadd.f32 %v260_v47, %v165_v14 }
 0x2b5   :  { %v2693_v48 = vmul.f32 0.17677669, %v259_v46 }
 0x2b6   :  { %v264_v50 = vpop.f32.mrb[6].mxu0 }
 0x2b7   :  { %v2697_v51 = vadd.f32 %v264_v50, %v161_v9  ;;  %v266_v52 = vpop.f32.mrb[7].mxu0  ;;  %2056 = vmatprep.mubr.msk.f32.mxu0 %vm285_vm1, %v2693_v48 }
 0x2b8   :  { %v2701_v53 = vadd.f32 %v266_v52, %v165_v14 }
 0x2b9   :  { %v2710_v57 = vpack.i.bf16 %v2697_v51, %v259_v46  ;;  %v272_v39 = vmul.f32 0.17677669, %v2697_v51  ;;  %v2760_v46 = vrot.slane %v2718_v61, %v164_v10 }
 0x2ba   :  { %v2364_v54 = vpack.i.bf16 %v2701_v53, %v2695_v49  ;;  %v2707_v56 = vpack.c.bf16 %v2701_v53, %v2695_v49  ;;  %v1100_v49 = vld [vmem:[%s3066_s6 + $0x18] sm:$0xff] }
 0x370   :  { %v2030_v63 = vpop.f32.mrb[0].mxu1 }
 0x371   :  { %v362_v0 = vpop.f32.mrb[1].mxu1  ;;  %v368_v2 = vadd.f32 %v2030_v63, %v2723_v62 }
 0x372   :  { %v363_v1 = vadd.f32 %v362_v0, %v2723_v62 }
 0x373   :  { %v375_v4 = vsel %vm371_vm3, %v368_v2, -inf }
 0x374   :  { %v372_v3 = vsel %vm371_vm3, %v363_v1, -inf }
 0x375   :  { %373 = vmax.xlane.f32.xlu1 %v372_v3 }
 0x379   :  { %376 = vmax.xlane.f32.xlu1 %v375_v4 }
 0x402   :  { %v374_v5 = vpop.xlane.xlu1 %373 }
 0x403   :  { %v378_v8 = vsub.f32 %v363_v1, %v374_v5 }
 0x405   :  { %v380_v9 = vmul.f32 1.442695, %v378_v8 }
 0x406   :  { %v377_v11 = vpop.xlane.xlu1 %376 }
 0x407   :  { %2377 = vpow2.f32 %v380_v9  ;;  %v379_v7 = vsub.f32 %v368_v2, %v377_v11 }
 0x409   :  { %v382_v12 = vmul.f32 1.442695, %v379_v7 }
 0x40b   :  { %2379 = vpow2.f32 %v382_v12 }
 0x411   :  { %v2378_v13 = vpop.eup %2377 }
 0x412   :  { %v384_v14 = vsel %vm371_vm3, %v2378_v13, 0.0 }
 0x413   :  { %385 = vadd.xlane.f32.xlu0 %v384_v14 }
 0x415   :  { %v2380_v16 = vpop.eup %2379 }
 0x416   :  { %v387_v17 = vsel %vm371_vm3, %v2380_v16, 0.0 }
 0x417   :  { %388 = vadd.xlane.f32.xlu1 %v387_v17 }
 0x428   :  { %2345 = vrot.lane.b32.xlu1 %v2661_v21, %s2440_s22 }
 0x429   :  { %477 = vrot.lane.b32.xlu0 %v270_v44, %s2441_s2 }
 0x42c   :  { %475 = vrot.lane.b32.xlu1 %v2653_v15, %s2441_s2 }
 0x430   :  { %2350 = vrot.lane.b32.xlu1 %v2710_v57, %s2439_s5 }
 0x4a0   :  { %v386_v18 = vpop.xlane.xlu0 %385 }
 0x4a1   :  { %2381 = vrcp.f32 %v386_v18 }
 0x4a4   :  { %v389_v23 = vpop.xlane.xlu1 %388  ;;  %v478_v37 = vpop.permute.xlu0 %477 }
 0x4a5   :  { %2383 = vrcp.f32 %v389_v23 }
 0x4a8   :  { %v2346_v24 = vpop.permute.xlu1 %2345 }
 0x4a9   :  { %v2348_v25 = vunpack.i.h.bf16 %v2346_v24  ;;  %v2347_v26 = vunpack.i.l.bf16 %v2346_v24 }
 0x4ab   :  { %v2382_v27 = vpop.eup %2381  ;;  %v2221_v28 = vpack.c.bf16 %v2348_v25, %v2347_v26 }
 0x4ac   :  { %v476_v29 = vpop.permute.xlu1 %475  ;;  %v392_v21 = vmul.f32 %v2382_v27, %v2378_v13 }
 0x4ad   :  { %2223 = vmatprep.subr.msk.bf16.mxu1 %vm2684_vm2, %v2221_v28 }
 0x4ae   :  { %2035 = vmatprep.mubr.msk.f32.mxu1 %vm371_vm3, %v392_v21 }
 0x4af   :  { %v2384_v15 = vpop.eup %2383 }
 0x4b0   :  { %v393_v30 = vmul.f32 %v2384_v15, %v2380_v16  ;;  %v2351_v31 = vpop.permute.xlu1 %2350 }
 0x4b1   :  { %v2353_v32 = vunpack.i.h.bf16 %v2351_v31  ;;  %v2352_v34 = vunpack.i.l.bf16 %v2351_v31 }
 0x4b2   :  { %2036 = vmatmul.mubr.msk.f32.vlgmr.msra.gmra.mrb[2].mxu1 %vm371_vm3, %v393_v30 }
 0x4b3   :  { %v2231_v36 = vpack.c.bf16 %v2353_v32, %v2352_v34  ;;  %2226 = vmatpush3.bf16.xpose.msk.msra.mxu1 %vm2684_vm2, %v2221_v28  ;;  %2042 = vmatprep.mubr.msk.f32.mxu1 %vm285_vm1, %v476_v29 }
 0x4b5   :  { %2233 = vmatprep.subr.msk.bf16.mxu0 %vm2684_vm2, %v2231_v36 }
 0x4b6   :  { %2236 = vmatpush3.bf16.xpose.msk.msra.mxu0 %vm2684_vm2, %v2231_v36 }
 0x4ba   :  { %2043 = vmatmul.mubr.msk.f32.vlgmr.msra.gmra.mrb[4].mxu1 %vm285_vm1, %v478_v37 }
 0x4bd   :  { %2057 = vmatmul.mubr.msk.f32.vlgmr.msra.gmra.mrb[8].mxu0 %vm285_vm1, %v272_v39 }
 0x585   :  { %v2752_v40 = vpop.f32.mrb[2].mxu1 }
 0x586   :  { %v2754_v41 = vpop.f32.mrb[3].mxu1 }
 0x58d   :  { %v2044_v43 = vpop.f32.mrb[4].mxu1 }
 0x58e   :  { %v563_v44 = vadd.f32 %v2044_v43, %v2723_v62  ;;  %v557_v45 = vpop.f32.mrb[5].mxu1 }
 0x58f   :  { %v558_v47 = vadd.f32 %v557_v45, %v2723_v62 }
 0x590   :  { %v2058_v50 = vpop.f32.mrb[8].mxu0  ;;  %v569_v51 = vsel %vm371_vm3, %v563_v44, -inf }
 0x591   :  { %570 = vmax.xlane.f32.xlu0 %v569_v51  ;;  %v773_v52 = vpop.f32.mrb[9].mxu0  ;;  %v566_v60 = vsel %vm371_vm3, %v558_v47, -inf  ;;  %v779_v1 = vadd.f32 %v2058_v50, %v2760_v46 }
 0x592   :  { %v774_v63 = vadd.f32 %v773_v52, %v2760_v46  ;;  %567 = vmax.xlane.f32.xlu1 %v566_v60 }
 0x593   :  { %v785_v6 = vsel %vm371_vm3, %v779_v1, -inf }
 0x594   :  { %v782_v0 = vsel %vm371_vm3, %v774_v63, -inf }
 0x596   :  { %783 = vmax.xlane.f32.xlu1 %v782_v0 }
 0x59a   :  { %786 = vmax.xlane.f32.xlu1 %v785_v6 }
 0x61e   :  { %v571_v10 = vpop.xlane.xlu0 %570 }
 0x61f   :  { %v568_v61 = vpop.xlane.xlu1 %567  ;;  %v573_v62 = vsub.f32 %v563_v44, %v571_v10  ;;  %v1097_v10 = vld [vmem:[%s3066_s6] sm:$0xff] }
 0x620   :  { %v572_v5 = vsub.f32 %v558_v47, %v568_v61  ;;  %v1099_v61 = vld [vmem:[%s3066_s6 + $0x10] sm:$0xff] }
 0x621   :  { %v576_v4 = vmul.f32 1.442695, %v573_v62  ;;  %v2255_v53 = vpack.c.bf16 %v1100_v49, %v1099_v61 }
 0x622   :  { %v574_v7 = vmul.f32 1.442695, %v572_v5 }
 0x623   :  { %v784_v2 = vpop.xlane.xlu1 %783 }
 0x624   :  { %v788_v3 = vsub.f32 %v774_v63, %v784_v2 }
 0x626   :  { %v790_v8 = vmul.f32 1.442695, %v788_v3 }
 0x627   :  { %v787_v9 = vpop.xlane.xlu1 %786 }
 0x628   :  { %2385 = vpow2.f32 %v790_v8  ;;  %v789_v11 = vsub.f32 %v779_v1, %v787_v9 }
 0x629   :  { %2387 = vpow2.f32 %v576_v4 }
 0x62a   :  { %v792_v12 = vmul.f32 1.442695, %v789_v11 }
 0x62c   :  { %2389 = vpow2.f32 %v792_v12 }
 0x62d   :  { %2391 = vpow2.f32 %v574_v7 }
 0x632   :  { %v2386_v13 = vpop.eup %2385 }
 0x633   :  { %v794_v14 = vsel %vm371_vm3, %v2386_v13, 0.0  ;;  %v2388_v16 = vpop.eup %2387 }
 0x634   :  { %795 = vadd.xlane.f32.xlu1 %v794_v14  ;;  %v581_v18 = vsel %vm371_vm3, %v2388_v16, 0.0 }
 0x636   :  { %v2390_v17 = vpop.eup %2389 }
 0x637   :  { %v797_v23 = vsel %vm371_vm3, %v2390_v17, 0.0  ;;  %v2392_v24 = vpop.eup %2391 }
 0x638   :  { %582 = vadd.xlane.f32.xlu1 %v581_v18  ;;  %798 = vadd.xlane.f32.xlu0 %v797_v23  ;;  %v578_v25 = vsel %vm371_vm3, %v2392_v24, 0.0  ;;  %v1101_v18 = vld [vmem:[%s3066_s6 + $0x20] sm:$0xff]  ;;  %v1102_v23 = vld [vmem:[%s3066_s6 + $0x28] sm:$0xff] }
 0x63c   :  { %579 = vadd.xlane.f32.xlu1 %v578_v25  ;;  %v1103_v25 = vld [vmem:[%s3066_s6 + $0x30] sm:$0xff] }
 0x64d   :  { %2355 = vrot.lane.b32.xlu1 %v2354_v22, %s2441_s2 }
 0x64e   :  { %2360 = vrot.lane.b32.xlu0 %v2710_v57, %s2440_s22 }
 0x651   :  { %885 = vrot.lane.b32.xlu1 %v2693_v48, %s2441_s2 }
 0x655   :  { %887 = vrot.lane.b32.xlu1 %v272_v39, %s2441_s2 }
 0x6c1   :  { %v796_v26 = vpop.xlane.xlu1 %795 }
 0x6c2   :  { %2393 = vrcp.f32 %v796_v26  ;;  %v1104_v26 = vld [vmem:[%s3066_s6 + $0x38] sm:$0xff] }
 0x6c5   :  { %v583_v27 = vpop.xlane.xlu1 %582  ;;  %v799_v29 = vpop.xlane.xlu0 %798 }
 0x6c6   :  { %2395 = vrcp.f32 %v583_v27  ;;  %v2263_v27 = vpack.c.bf16 %v1104_v26, %v1103_v25 }
 0x6c9   :  { %v580_v28 = vpop.xlane.xlu1 %579  ;;  %v2361_v22 = vpop.permute.xlu0 %2360 }
 0x6ca   :  { %2397 = vrcp.f32 %v580_v28  ;;  %v2363_v31 = vunpack.i.h.bf16 %v2361_v22  ;;  %v2362_v32 = vunpack.i.l.bf16 %v2361_v22 }
 0x6cb   :  { %2399 = vrcp.f32 %v799_v29 }
 0x6cc   :  { %v2394_v30 = vpop.eup %2393  ;;  %v2241_v43 = vpack.c.bf16 %v2363_v31, %v2362_v32 }
 0x6cd   :  { %v2356_v21 = vpop.permute.xlu1 %2355  ;;  %v802_v39 = vmul.f32 %v2394_v30, %v2386_v13 }
 0x6ce   :  { %v2358_v15 = vunpack.i.h.bf16 %v2356_v21  ;;  %v2357_v19 = vunpack.i.l.bf16 %v2356_v21 }
 0x6d0   :  { %v2227_v20 = vpack.c.bf16 %v2358_v15, %v2357_v19  ;;  %v2396_v57 = vpop.eup %2395 }
 0x6d1   :  { %v587_v36 = vmul.f32 %v2396_v57, %v2388_v16  ;;  %v886_v45 = vpop.permute.xlu1 %885 }
 0x6d2   :  { %2228 = vmatprep.subr.bf16.mxu1 %v2227_v20 }
 0x6d3   :  { %2230 = vmatpush3.bf16.msra.mxu1 %v2227_v20 }
 0x6d4   :  { %v2398_v48 = vpop.eup %2397  ;;  %2238 = vmatprep.subr.bf16.mxu1 %v2707_v56 }
 0x6d5   :  { %v586_v34 = vmul.f32 %v2398_v48, %v2392_v24  ;;  %v2400_v37 = vpop.eup %2399  ;;  %v888_v47 = vpop.permute.xlu1 %887  ;;  %v2259_v24 = vpack.c.bf16 %v1102_v23, %v1101_v18 }
 0x6d6   :  { %v803_v44 = vmul.f32 %v2400_v37, %v2390_v17 }
 0x6d7   :  { %2049 = vmatprep.mubr.msk.f32.mxu1 %vm371_vm3, %v586_v34 }
 0x6d8   :  { %2050 = vmatmul.mubr.msk.f32.vlgmr.msra.gmra.mrb[6].mxu1 %vm371_vm3, %v587_v36 }
 0x6d9   :  { %2240 = vmatpush3.bf16.msra.mxu1 %v2707_v56  ;;  %2063 = vmatprep.mubr.msk.f32.mxu1 %vm371_vm3, %v802_v39 }
 0x6da   :  { %2243 = vmatprep.subr.msk.bf16.mxu1 %vm2684_vm2, %v2241_v43 }
 0x6dc   :  { %2064 = vmatmul.mubr.msk.f32.vlgmr.msra.gmra.mrb[8].mxu1 %vm371_vm3, %v803_v44 }
 0x6dd   :  { %2070 = vmatprep.mubr.msk.f32.mxu1 %vm285_vm1, %v886_v45 }
 0x6e2   :  { %2246 = vmatpush3.bf16.xpose.msk.msra.mxu1 %vm2684_vm2, %v2241_v43 }
 0x6e9   :  { %2071 = vmatmul.mubr.msk.f32.vlgmr.msra.gmra.mrb[10].mxu1 %vm285_vm1, %v888_v47 }
 0x7ab   :  { %v2051_v50 = vpop.f32.mrb[6].mxu1 }
 0x7ac   :  { %v668_v51 = vpop.f32.mrb[7].mxu1 }
 0x7af   :  { %v2794_v56 = vpop.f32.mrb[8].mxu1 }
 0x7b0   :  { %v2796_v52 = vpop.f32.mrb[9].mxu1 }
 0x7bc   :  { %v2072_v60 = vpop.f32.mrb[10].mxu1 }
 0x7bd   :  { %v973_v63 = vadd.f32 %v2072_v60, %v2760_v46  ;;  %v967_v0 = vpop.f32.mrb[11].mxu1 }
 0x7be   :  { %v968_v1 = vadd.f32 %v967_v0, %v2760_v46  ;;  %v1098_v46 = vld [vmem:[%s3066_s6 + $0x8] sm:$0xff] }
 0x7bf   :  { %v979_v6 = vsel %vm371_vm3, %v973_v63, -inf  ;;  %v2251_v62 = vpack.c.bf16 %v1098_v46, %v1097_v10 }
 0x7c0   :  { %980 = vmax.xlane.f32.xlu1 %v979_v6  ;;  %v976_v42 = vsel %vm371_vm3, %v968_v1, -inf }
 0x7c1   :  { %977 = vmax.xlane.f32.xlu0 %v976_v42  ;;  %2252 = vmatprep.subr.bf16.mxu0 %v2251_v62 }
 0x7c2   :  { %2254 = vmatpush3.bf16.msra.mxu0 %v2251_v62 }
 0x7c3   :  { %2256 = vmatprep.subr.bf16.mxu0 %v2255_v53 }
 0x7c6   :  { %2258 = vmatpush3.bf16.msra.mxu0 %v2255_v53 }
 0x7c7   :  { %2260 = vmatprep.subr.bf16.mxu0 %v2259_v24 }
 0x7ca   :  { %2262 = vmatpush3.bf16.msra.mxu0 %v2259_v24 }
 0x7cb   :  { %2264 = vmatprep.subr.bf16.mxu0 %v2263_v27 }
 0x7ce   :  { %2266 = vmatpush3.bf16.msra.mxu0 %v2263_v27 }
 0x7d1   :  { %2365 = vrot.lane.b32.xlu1 %v2364_v54, %s2441_s2 }
 0x7d5   :  { %681 = vrot.lane.b32.xlu1 %v2051_v50, %s2440_s22 }
 0x84d   :  { %v981_v54 = vpop.xlane.xlu1 %980 }
 0x84e   :  { %v983_v2 = vsub.f32 %v973_v63, %v981_v54  ;;  %v978_v3 = vpop.xlane.xlu0 %977 }
 0x84f   :  { %v982_v4 = vsub.f32 %v968_v1, %v978_v3 }
 0x850   :  { %v986_v5 = vmul.f32 1.442695, %v983_v2 }
 0x851   :  { %v984_v8 = vmul.f32 1.442695, %v982_v4  ;;  %v2366_v9 = vpop.permute.xlu1 %2365 }
 0x852   :  { %v2368_v11 = vunpack.i.h.bf16 %v2366_v9  ;;  %v2367_v7 = vunpack.i.l.bf16 %v2366_v9 }
 0x853   :  { %2401 = vpow2.f32 %v984_v8  ;;  %v1290_v8 = vld [vmem:[%s3068_s10 + $0x18] sm:$0xff] }
 0x854   :  { %v2247_v12 = vpack.c.bf16 %v2368_v11, %v2367_v7  ;;  %2403 = vpow2.f32 %v986_v5  ;;  %v1289_v5 = vld [vmem:[%s3068_s10 + $0x10] sm:$0xff]  ;;  %v1291_v11 = vld [vmem:[%s3068_s10 + $0x20] sm:$0xff]  ;;  %v1292_v7 = vld [vmem:[%s3068_s10 + $0x28] sm:$0xff] }
 0x855   :  { %v682_v21 = vpop.permute.xlu1 %681  ;;  %v2271_v9 = vpack.c.bf16 %v1290_v8, %v1289_v5 }
 0x856   :  { %2248 = vmatprep.subr.bf16.mxu1 %v2247_v12  ;;  %v686_v20 = vsel %vm285_vm1, %v2752_v40, %v682_v21  ;;  %v1914_v40 = vld [vmem:[%s3067_s7] ss:$0 sm:$0xff] }
 0x857   :  { %2250 = vmatpush3.bf16.msra.mxu1 %v2247_v12  ;;  %v2275_v12 = vpack.c.bf16 %v1292_v7, %v1291_v11 }
 0x85d   :  { %v2402_v13 = vpop.eup %2401 }
 0x85e   :  { %v988_v14 = vsel %vm371_vm3, %v2402_v13, 0.0  ;;  %v2404_v16 = vpop.eup %2403 }
 0x85f   :  { %989 = vadd.xlane.f32.xlu0 %v988_v14  ;;  %v991_v17 = vsel %vm371_vm3, %v2404_v16, 0.0  ;;  %v1294_v14 = vld [vmem:[%s3068_s10 + $0x38] sm:$0xff] }
 0x863   :  { %992 = vadd.xlane.f32.xlu0 %v991_v17 }
 0x879   :  { %679 = vrot.lane.b32.xlu0 %v668_v51, %s2440_s22 }
 0x8ec   :  { %v990_v28 = vpop.xlane.xlu0 %989 }
 0x8ed   :  { %2405 = vrcp.f32 %v990_v28 }
 0x8f0   :  { %v993_v29 = vpop.xlane.xlu0 %992 }
 0x8f1   :  { %2407 = vrcp.f32 %v993_v29 }
 0x8f4   :  { %v680_v15 = vpop.permute.xlu0 %679 }
 0x8f5   :  { %v685_v19 = vsel %vm285_vm1, %v2754_v41, %v680_v15 }
 0x8f6   :  { %2096 = vmatprep.mubr.msk.f32.mxu0 %vm66_vm0, %v685_v19 }
 0x8f7   :  { %v2406_v22 = vpop.eup %2405  ;;  %2097 = vmatmul.mubr.msk.f32.vlgmr.msra.gmra.mrb[10].mxu0 %vm66_vm0, %v686_v20 }
 0x8f8   :  { %v996_v30 = vmul.f32 %v2406_v22, %v2402_v13  ;;  %v1293_v13 = vld [vmem:[%s3068_s10 + $0x30] sm:$0xff] }
 0x8fa   :  { %2077 = vmatprep.mubr.msk.f32.mxu1 %vm371_vm3, %v996_v30 }
 0x8fb   :  { %v2408_v57 = vpop.eup %2407 }
 0x8fc   :  { %v997_v48 = vmul.f32 %v2408_v57, %v2404_v16  ;;  %v2279_v16 = vpack.c.bf16 %v1294_v14, %v1293_v13 }
 0x8fe   :  { %2078 = vmatmul.mubr.msk.f32.vlgmr.msra.gmra.mrb[12].mxu1 %vm371_vm3, %v997_v48 }
 0x9ca   :  { %v2098_v31 = vpop.f32.mrb[10].mxu0 }
 0x9cb   :  { %v1190_v32 = vpop.f32.mrb[11].mxu0  ;;  %v1196_v36 = vadd.f32 %v2098_v31, %v1914_v40  ;;  %v2904_v31 = vld [vmem:[%s3069_s8] ss:$0 sm:$0xff] }
 0x9cc   :  { %v1191_v39 = vadd.f32 %v1914_v40, %v1190_v32 }
 0x9cd   :  { %v1210_v37 = vadd.f32 %v1196_v36, %v2635_v58 }
 0x9ce   :  { %v1209_v44 = vadd.f32 %v1191_v39, %v2627_v55 }
 0x9cf   :  { %v1218_v43 = vsel %vm66_vm0, %v1210_v37, 0.0 }
 0x9d0   :  { %v1215_v45 = vsel %vm66_vm0, %v1209_v44, 0.0 }
 0x9d1   :  { %v2079_v34 = vpop.f32.mrb[12].mxu1 }
 0x9d2   :  { %1091 = vrot.lane.b32.xlu0 %v2079_v34, %s2440_s22  ;;  %v1078_v41 = vpop.f32.mrb[13].mxu1 }
 0x9d3   :  { %1089 = vrot.lane.b32.xlu1 %v1078_v41, %s2440_s22 }
 0x9f1   :  { %1219 = vadd.xlane.f32.xlu0 %v1218_v43 }
 0x9f7   :  { %1216 = vadd.xlane.f32.xlu1 %v1215_v45  ;;  %v1436_v45 = vld [vmem:[%s3071_s12 + $0x8] sm:$0xff] }
 0xa44   :  { %v1092_v47 = vpop.permute.xlu0 %1091 }
 0xa45   :  { %v1090_v50 = vpop.permute.xlu1 %1089  ;;  %v1096_v60 = vsel %vm285_vm1, %v2794_v56, %v1092_v47 }
 0xa46   :  { %v1095_v51 = vsel %vm285_vm1, %v2796_v52, %v1090_v50  ;;  %v1437_v50 = vld [vmem:[%s3071_s12 + $0x10] sm:$0xff] }
 0xa47   :  { %2099 = vmatprep.mubr.msk.f32.mxu0 %vm66_vm0, %v1095_v51  ;;  %v1438_v51 = vld [vmem:[%s3071_s12 + $0x18] sm:$0xff] }
 0xa48   :  { %2100 = vmatmul.mubr.msk.f32.gmra.mrb[12].mxu0 %vm66_vm0, %v1096_v60  ;;  %v2287_v60 = vpack.c.bf16 %v1438_v51, %v1437_v50 }
 0xa7e   :  { %v1220_v58 = vpop.xlane.xlu0 %1219 }
 0xa7f   :  { %v1228_v0 = vmul.f32 0.015625, %v1220_v58  ;;  %v1439_v58 = vld [vmem:[%s3071_s12 + $0x20] sm:$0xff] }
 0xa81   :  { %v2857_v6 = vsub.f32 %v1210_v37, %v1228_v0 }
 0xa83   :  { %v1236_v49 = vmul.f32 %v2857_v6, %v2857_v6 }
 0xa84   :  { %v1217_v63 = vpop.xlane.xlu1 %1216 }
 0xa85   :  { %v1227_v1 = vmul.f32 0.015625, %v1217_v63  ;;  %v1242_v2 = vsel %vm66_vm0, %v1236_v49, 0.0  ;;  %v1440_v63 = vld [vmem:[%s3071_s12 + $0x28] sm:$0xff] }
 0xa86   :  { %v2291_v0 = vpack.c.bf16 %v1440_v63, %v1439_v58  ;;  %v1448_v49 = vld [vmem:[%s3071_s12 + $0x68] sm:$0xff] }
 0xa87   :  { %v1231_v46 = vsub.f32 %v1209_v44, %v1227_v1  ;;  %v1435_v44 = vld [vmem:[%s3071_s12] sm:$0xff]  ;;  %v1441_v1 = vld [vmem:[%s3071_s12 + $0x30] sm:$0xff] }
 0xa88   :  { %v2283_v47 = vpack.c.bf16 %v1436_v45, %v1435_v44 }
 0xa89   :  { %v1235_v54 = vmul.f32 %v1231_v46, %v1231_v46 }
 0xa8a   :  { %2284 = vmatprep.subr.bf16.mxu0 %v2283_v47 }
 0xa8b   :  { %v1239_v3 = vsel %vm66_vm0, %v1235_v54, 0.0  ;;  %2286 = vmatpush3.bf16.msra.mxu0 %v2283_v47  ;;  %v1449_v54 = vld [vmem:[%s3071_s12 + $0x70] sm:$0xff] }
 0xa8c   :  { %2288 = vmatprep.subr.bf16.mxu0 %v2287_v60 }
 0xa8f   :  { %2290 = vmatpush3.bf16.msra.mxu0 %v2287_v60 }
 0xa90   :  { %2292 = vmatprep.subr.bf16.mxu0 %v2291_v0 }
 0xa93   :  { %2294 = vmatpush3.bf16.msra.mxu0 %v2291_v0 }
 0xb1b   :  { %v2101_v55 = vpop.f32.mrb[12].mxu0 }
 0xb1c   :  { %v1206_v42 = vadd.f32 %v2101_v55, %v1914_v40  ;;  %v1200_v10 = vpop.f32.mrb[13].mxu0  ;;  %v1442_v55 = vld [vmem:[%s3071_s12 + $0x38] sm:$0xff] }
 0xb1d   :  { %v1201_v61 = vadd.f32 %v1914_v40, %v1200_v10  ;;  %v2910_v40 = vld [vmem:[%s3070_s9] ss:$0 sm:$0xff]  ;;  %v1444_v10 = vld [vmem:[%s3071_s12 + $0x48] sm:$0xff] }
 0xb1e   :  { %v1212_v52 = vadd.f32 %v1206_v42, %v2678_v38  ;;  %v1288_v38 = vld [vmem:[%s3068_s10 + $0x8] sm:$0xff]  ;;  %v1443_v42 = vld [vmem:[%s3071_s12 + $0x40] sm:$0xff] }
 0xb1f   :  { %v1211_v62 = vadd.f32 %v1201_v61, %v2671_v35  ;;  %v1287_v35 = vld [vmem:[%s3068_s10] sm:$0xff]  ;;  %v1445_v61 = vld [vmem:[%s3071_s12 + $0x50] sm:$0xff] }
 0xb20   :  { %v1224_v56 = vsel %vm66_vm0, %v1212_v52, 0.0  ;;  %v2267_v4 = vpack.c.bf16 %v1288_v38, %v1287_v35 }
 0xb21   :  { %1225 = vadd.xlane.f32.xlu1 %v1224_v56  ;;  %v1221_v53 = vsel %vm66_vm0, %v1211_v62, 0.0  ;;  %v1447_v56 = vld [vmem:[%s3071_s12 + $0x60] sm:$0xff] }
 0xb22   :  { %1222 = vadd.xlane.f32.xlu0 %v1221_v53  ;;  %2268 = vmatprep.subr.bf16.mxu1 %v2267_v4  ;;  %v2307_v53 = vpack.c.bf16 %v1448_v49, %v1447_v56 }
 0xb23   :  { %2270 = vmatpush3.bf16.msra.mxu1 %v2267_v4 }
 0xb24   :  { %2272 = vmatprep.subr.bf16.mxu1 %v2271_v9 }
 0xb25   :  { %1243 = vadd.xlane.f32.xlu1 %v1242_v2  ;;  %v1450_v2 = vld [vmem:[%s3071_s12 + $0x78] sm:$0xff] }
 0xb26   :  { %1240 = vadd.xlane.f32.xlu0 %v1239_v3  ;;  %v2311_v3 = vpack.c.bf16 %v1450_v2, %v1449_v54 }
 0xb27   :  { %2274 = vmatpush3.bf16.msra.mxu1 %v2271_v9 }
 0xb28   :  { %2276 = vmatprep.subr.bf16.mxu1 %v2275_v12 }
 0xb2b   :  { %2278 = vmatpush3.bf16.msra.mxu1 %v2275_v12 }
 0xb2c   :  { %2280 = vmatprep.subr.bf16.mxu1 %v2279_v16 }
 0xb2f   :  { %2282 = vmatpush3.bf16.msra.mxu1 %v2279_v16 }
 0xbae   :  { %v1226_v17 = vpop.xlane.xlu1 %1225 }
 0xbaf   :  { %v1230_v18 = vmul.f32 0.015625, %v1226_v17  ;;  %v1223_v23 = vpop.xlane.xlu0 %1222 }
 0xbb0   :  { %v1229_v24 = vmul.f32 0.015625, %v1223_v23  ;;  %v1921_v23 = vld [vmem:[%s3072_s11] ss:$0 sm:$0xff] }
 0xbb1   :  { %v2891_v25 = vsub.f32 %v1212_v52, %v1230_v18  ;;  %v1446_v52 = vld [vmem:[%s3071_s12 + $0x58] sm:$0xff] }
 0xbb2   :  { %v2893_v26 = vsub.f32 %v1211_v62, %v1229_v24  ;;  %v1244_v27 = vpop.xlane.xlu1 %1243  ;;  %v2303_v62 = vpack.c.bf16 %v1446_v52, %v1445_v61 }
 0xbb3   :  { %v1252_v28 = vmul.f32 0.015625, %v1244_v27  ;;  %v1241_v29 = vpop.xlane.xlu0 %1240  ;;  %v1238_v21 = vmul.f32 %v2891_v25, %v2891_v25 }
 0xbb4   :  { %v1251_v15 = vmul.f32 0.015625, %v1241_v29  ;;  %v1237_v19 = vmul.f32 %v2893_v26, %v2893_v26 }
 0xbb5   :  { %v1256_v20 = vadd.f32 1e-12, %v1252_v28  ;;  %v1248_v22 = vsel %vm66_vm0, %v1238_v21, 0.0 }
 0xbb6   :  { %v1255_v30 = vadd.f32 1e-12, %v1251_v15  ;;  %1249 = vadd.xlane.f32.xlu1 %v1248_v22  ;;  %v1245_v57 = vsel %vm66_vm0, %v1237_v19, 0.0 }
 0xbb7   :  { %2409 = vrsqrt.f32 %v1256_v20  ;;  %1246 = vadd.xlane.f32.xlu0 %v1245_v57 }
 0xbb8   :  { %2411 = vrsqrt.f32 %v1255_v30 }
 0xbc1   :  { %v2410_v48 = vpop.eup %2409 }
 0xbc2   :  { %v2412_v32 = vpop.eup %2411  ;;  %v1264_v34 = vmul.f32 %v2410_v48, %v2857_v6  ;;  %v2295_v6 = vpack.c.bf16 %v1442_v55, %v1441_v1 }
 0xbc3   :  { %v1263_v41 = vmul.f32 %v2412_v32, %v1231_v46  ;;  %v2299_v46 = vpack.c.bf16 %v1444_v10, %v1443_v42 }
 0xbc4   :  { %v1274_v36 = vmul.f32 %v2904_v31, %v1264_v34  ;;  %2296 = vmatprep.subr.bf16.mxu0 %v2295_v6 }
 0xbc5   :  { %v1273_v37 = vmul.f32 %v2904_v31, %v1263_v41  ;;  %2298 = vmatpush3.bf16.msra.mxu0 %v2295_v6 }
 0xbc6   :  { %v2918_v43 = vadd.f32 %v2910_v40, %v1274_v36  ;;  %2300 = vmatprep.subr.bf16.mxu0 %v2299_v46 }
 0xbc7   :  { %v2915_v39 = vadd.f32 %v2910_v40, %v1273_v37 }
 0xbc9   :  { %2118 = vmatprep.mubr.msk.f32.mxu1 %vm66_vm0, %v2915_v39  ;;  %2302 = vmatpush3.bf16.msra.mxu0 %v2299_v46 }
 0xbca   :  { %2119 = vmatmul.mubr.msk.f32.vlgmr.msra.gmra.mrb[14].mxu1 %vm66_vm0, %v2918_v43  ;;  %2304 = vmatprep.subr.bf16.mxu0 %v2303_v62 }
 0xbcd   :  { %2306 = vmatpush3.bf16.msra.mxu0 %v2303_v62 }
 0xbce   :  { %2308 = vmatprep.subr.bf16.mxu0 %v2307_v53 }
 0xbd1   :  { %2310 = vmatpush3.bf16.msra.mxu0 %v2307_v53 }
 0xbd2   :  { %2312 = vmatprep.subr.bf16.mxu0 %v2311_v3 }
 0xbd5   :  { %2314 = vmatpush3.bf16.msra.mxu0 %v2311_v3  ;;  %v1926_v3 = vld [vmem:[%s3073_s13] ss:$0 sm:$0xff] }
 0xc43   :  { %v1250_v35 = vpop.xlane.xlu1 %1249 }
 0xc44   :  { %v1254_v38 = vmul.f32 0.015625, %v1250_v35  ;;  %v1247_v4 = vpop.xlane.xlu0 %1246 }
 0xc45   :  { %v1253_v5 = vmul.f32 0.015625, %v1247_v4 }
 0xc46   :  { %v1258_v8 = vadd.f32 1e-12, %v1254_v38 }
 0xc47   :  { %v1257_v9 = vadd.f32 1e-12, %v1253_v5 }
 0xc48   :  { %2413 = vrsqrt.f32 %v1258_v8 }
 0xc49   :  { %2415 = vrsqrt.f32 %v1257_v9 }
 0xc52   :  { %v2414_v11 = vpop.eup %2413 }
 0xc53   :  { %v2416_v7 = vpop.eup %2415  ;;  %v1266_v12 = vmul.f32 %v2414_v11, %v2891_v25 }
 0xc54   :  { %v1265_v13 = vmul.f32 %v2416_v7, %v2893_v26 }
 0xc55   :  { %v1276_v14 = vmul.f32 %v2904_v31, %v1266_v12 }
 0xc56   :  { %v1275_v16 = vmul.f32 %v2904_v31, %v1265_v13 }
 0xc57   :  { %v2980_v18 = vadd.f32 %v2910_v40, %v1276_v14 }
 0xc58   :  { %v2977_v17 = vadd.f32 %v2910_v40, %v1275_v16 }
 0xc5a   :  { %2121 = vmatprep.mubr.msk.f32.mxu1 %vm66_vm0, %v2977_v17 }
 0xc5b   :  { %2122 = vmatmul.mubr.msk.f32.gmra.mrb[16].mxu1 %vm66_vm0, %v2980_v18 }
 0xc5c   :  { %2166 = vmatprep.mubr.msk.f32.mxu1 %vm2443_vm4, %v2438_v33 }
 0xc9d   :  { %v2120_v24 = vpop.f32.mrb[14].mxu1 }
 0xc9e   :  { %v1386_v25 = vadd.f32 %v2120_v24, %v1921_v23  ;;  %v1380_v26 = vpop.f32.mrb[15].mxu1 }
 0xc9f   :  { %v1381_v27 = vadd.f32 %v1921_v23, %v1380_v26 }
 0xca0   :  { %v1400_v28 = vmul.f32 %v1386_v25, %v1386_v25 }
 0xca1   :  { %v1399_v29 = vmul.f32 %v1381_v27, %v1381_v27 }
 0xca2   :  { %v1404_v21 = vmul.f32 %v1400_v28, %v1386_v25 }
 0xca3   :  { %v1403_v15 = vmul.f32 %v1399_v29, %v1381_v27 }
 0xca4   :  { %v1408_v19 = vmul.f32 0.044715, %v1404_v21 }
 0xca5   :  { %v1407_v20 = vmul.f32 0.044715, %v1403_v15 }
 0xca6   :  { %v1412_v22 = vadd.f32 %v1408_v19, %v1386_v25 }
 0xca7   :  { %v1411_v30 = vadd.f32 %v1407_v20, %v1381_v27 }
 0xca8   :  { %v1416_v57 = vmul.f32 0.7978846, %v1412_v22 }
 0xca9   :  { %v1415_v48 = vmul.f32 0.7978846, %v1411_v30 }
 0xcaa   :  { %2417 = vtanh.f32 %v1416_v57 }
 0xcab   :  { %2419 = vtanh.f32 %v1415_v48 }
 0xcb4   :  { %v2418_v31 = vpop.eup %2417 }
 0xcb5   :  { %v2420_v32 = vpop.eup %2419  ;;  %v1424_v34 = vadd.f32 1.0, %v2418_v31 }
 0xcb6   :  { %v1423_v41 = vadd.f32 1.0, %v2420_v32 }
 0xcb7   :  { %v1428_v40 = vmul.f32 0.5, %v1424_v34 }
 0xcb8   :  { %v1427_v36 = vmul.f32 0.5, %v1423_v41 }
 0xcb9   :  { %v1432_v44 = vmul.f32 %v1428_v40, %v1386_v25 }
 0xcba   :  { %v1431_v37 = vmul.f32 %v1427_v36, %v1381_v27 }
 0xcbc   :  { %2156 = vmatprep.mubr.f32.mxu0 %v1431_v37 }
 0xcbd   :  { %2157 = vmatmul.mubr.f32.vlgmr.msra.gmra.mrb[14].mxu0 %v1432_v44 }
 0xd2e   :  { %v2123_v45 = vpop.f32.mrb[16].mxu1 }
 0xd2f   :  { %v1396_v47 = vadd.f32 %v2123_v45, %v1921_v23  ;;  %v1390_v50 = vpop.f32.mrb[17].mxu1 }
 0xd30   :  { %v1391_v51 = vadd.f32 %v1921_v23, %v1390_v50 }
 0xd31   :  { %v1402_v60 = vmul.f32 %v1396_v47, %v1396_v47 }
 0xd32   :  { %v1401_v58 = vmul.f32 %v1391_v51, %v1391_v51 }
 0xd33   :  { %v1406_v63 = vmul.f32 %v1402_v60, %v1396_v47 }
 0xd34   :  { %v1405_v0 = vmul.f32 %v1401_v58, %v1391_v51  ;;  %v1927_v58 = vld [vmem:[%s3074_s14] ss:$0 sm:$0xff] }
 0xd35   :  { %v1410_v1 = vmul.f32 0.044715, %v1406_v63 }
 0xd36   :  { %v1409_v55 = vmul.f32 0.044715, %v1405_v0 }
 0xd37   :  { %v1414_v6 = vadd.f32 %v1410_v1, %v1396_v47 }
 0xd38   :  { %v1413_v42 = vadd.f32 %v1409_v55, %v1391_v51  ;;  %v1928_v55 = vld [vmem:[%s3075_s15] ss:$0 sm:$0xff] }
 0xd39   :  { %v1418_v10 = vmul.f32 0.7978846, %v1414_v6 }
 0xd3a   :  { %v1417_v46 = vmul.f32 0.7978846, %v1413_v42 }
 0xd3b   :  { %2421 = vtanh.f32 %v1418_v10 }
 0xd3c   :  { %2423 = vtanh.f32 %v1417_v46 }
 0xd45   :  { %v2422_v61 = vpop.eup %2421 }
 0xd46   :  { %v2424_v52 = vpop.eup %2423  ;;  %v1426_v62 = vadd.f32 1.0, %v2422_v61 }
 0xd47   :  { %v1425_v56 = vadd.f32 1.0, %v2424_v52  ;;  %v1775_v52 = vsel %vm1774_vm5, %v2715_v59, 0.0 }
 0xd48   :  { %v1430_v49 = vmul.f32 0.5, %v1426_v62  ;;  %v2437_v62 = vld [vmem:[%s3065_s1] sm:$0x3] }
 0xd49   :  { %v1429_v53 = vmul.f32 0.5, %v1425_v56  ;;  %v1695_v56 = vsel %vm1694_vm6, %v2437_v62, 0.0 }
 0xd4a   :  { %v1434_v2 = vmul.f32 %v1430_v49, %v1396_v47 }
 0xd4b   :  { %v1433_v54 = vmul.f32 %v1429_v53, %v1391_v51 }
 0xd4d   :  { %2159 = vmatprep.mubr.f32.mxu0 %v1433_v54 }
 0xd4e   :  { %2160 = vmatmul.mubr.f32.gmra.mrb[16].mxu0 %v1434_v2 }
 0xd90   :  { %v2158_v35 = vpop.f32.mrb[14].mxu0 }
 0xd91   :  { %v1530_v38 = vadd.f32 %v2158_v35, %v1926_v3  ;;  %v1524_v4 = vpop.f32.mrb[15].mxu0 }
 0xd92   :  { %v1525_v5 = vadd.f32 %v1926_v3, %v1524_v4 }
 0xd93   :  { %v1544_v8 = vadd.f32 %v1530_v38, %v2918_v43 }
 0xd94   :  { %v1543_v9 = vadd.f32 %v1525_v5, %v2915_v39 }
 0xd95   :  { %v1552_v11 = vsel %vm66_vm0, %v1544_v8, 0.0 }
 0xd96   :  { %1553 = vadd.xlane.f32.xlu1 %v1552_v11  ;;  %v1549_v7 = vsel %vm66_vm0, %v1543_v9, 0.0 }
 0xd97   :  { %1550 = vadd.xlane.f32.xlu0 %v1549_v7 }
 0xe21   :  { %v2161_v12 = vpop.f32.mrb[16].mxu0 }
 0xe22   :  { %v1540_v13 = vadd.f32 %v2161_v12, %v1926_v3  ;;  %v1534_v14 = vpop.f32.mrb[17].mxu0  ;;  %v1791_v12 = vld [vmem:[%s3076_s16] sm:$0xff] }
 0xe23   :  { %v1535_v16 = vadd.f32 %v1926_v3, %v1534_v14  ;;  %v1554_v23 = vpop.xlane.xlu1 %1553 }
 0xe24   :  { %v1562_v24 = vmul.f32 0.015625, %v1554_v23  ;;  %v1551_v25 = vpop.xlane.xlu0 %1550  ;;  %v1546_v26 = vadd.f32 %v1540_v13, %v2980_v18  ;;  %v2442_v18 = vmov 0.0|0.0   ;;  %v1792_v13 = vld [vmem:[%s3076_s16 + $0x8] sm:$0xff] }
 0xe25   :  { %v1561_v27 = vmul.f32 0.015625, %v1551_v25  ;;  %v1545_v43 = vadd.f32 %v1535_v16, %v2977_v17  ;;  %2315 = vmatprep.subr.bf16.mxu1 %v2442_v18  ;;  %v1701_v16 = vrot.slane %v2437_v62, 1  ;;  %v2322_v23 = vpack.c.bf16 %v1792_v13, %v1791_v12  ;;  %v1794_v25 = vld [vmem:[%s3076_s16 + $0x18] sm:$0xff] }
 0xe26   :  { %v1566_v28 = vsub.f32 %v1544_v8, %v1562_v24  ;;  %v1558_v39 = vsel %vm66_vm0, %v1546_v26, 0.0  ;;  %v1793_v24 = vld [vmem:[%s3076_s16 + $0x10] sm:$0xff] }
 0xe27   :  { %v1565_v29 = vsub.f32 %v1543_v9, %v1561_v27  ;;  %1559 = vadd.xlane.f32.xlu1 %v1558_v39  ;;  %v1555_v21 = vsel %vm66_vm0, %v1545_v43, 0.0  ;;  %v1796_v39 = vld [vmem:[%s3076_s16 + $0x28] sm:$0xff] }
 0xe28   :  { %1556 = vadd.xlane.f32.xlu0 %v1555_v21  ;;  %v1570_v15 = vmul.f32 %v1566_v28, %v1566_v28  ;;  %v1798_v21 = vld [vmem:[%s3076_s16 + $0x38] sm:$0xff] }
 0xe29   :  { %v1569_v19 = vmul.f32 %v1565_v29, %v1565_v29 }
 0xe2a   :  { %v1576_v20 = vsel %vm66_vm0, %v1570_v15, 0.0 }
 0xe2b   :  { %1577 = vadd.xlane.f32.xlu1 %v1576_v20  ;;  %v1573_v22 = vsel %vm66_vm0, %v1569_v19, 0.0 }
 0xe2c   :  { %1574 = vadd.xlane.f32.xlu0 %v1573_v22 }
 0xeb4   :  { %v1560_v17 = vpop.xlane.xlu1 %1559 }
 0xeb5   :  { %v1564_v30 = vmul.f32 0.015625, %v1560_v17  ;;  %v1557_v57 = vpop.xlane.xlu0 %1556 }
 0xeb6   :  { %v1563_v48 = vmul.f32 0.015625, %v1557_v57 }
 0xeb7   :  { %v1568_v31 = vsub.f32 %v1546_v26, %v1564_v30  ;;  %v2325_v26 = vpack.c.bf16 %v1794_v25, %v1793_v24 }
 0xeb8   :  { %v1567_v32 = vsub.f32 %v1545_v43, %v1563_v48  ;;  %v1578_v34 = vpop.xlane.xlu1 %1577 }
 0xeb9   :  { %v1586_v41 = vmul.f32 0.015625, %v1578_v34  ;;  %v1575_v40 = vpop.xlane.xlu0 %1574  ;;  %v1572_v36 = vmul.f32 %v1568_v31, %v1568_v31 }
 0xeba   :  { %v1585_v37 = vmul.f32 0.015625, %v1575_v40  ;;  %v1571_v44 = vmul.f32 %v1567_v32, %v1567_v32 }
 0xebb   :  { %v1590_v45 = vadd.f32 1e-12, %v1586_v41  ;;  %v1582_v47 = vsel %vm66_vm0, %v1572_v36, 0.0 }
 0xebc   :  { %v1589_v50 = vadd.f32 1e-12, %v1585_v37  ;;  %1583 = vadd.xlane.f32.xlu1 %v1582_v47  ;;  %v1579_v51 = vsel %vm66_vm0, %v1571_v44, 0.0  ;;  %v1931_v37 = vld [vmem:[%s3077_s17] ss:$0 sm:$0xff] }
 0xebd   :  { %2425 = vrsqrt.f32 %v1590_v45  ;;  %1580 = vadd.xlane.f32.xlu0 %v1579_v51 }
 0xebe   :  { %2427 = vrsqrt.f32 %v1589_v50 }
 0xec0   :  { %1696 = vadd.xlane.f32.xlu1 %v1695_v56 }
 0xec1   :  { %1776 = vadd.xlane.f32.xlu0 %v1775_v52 }
 0xec7   :  { %v2426_v60 = vpop.eup %2425 }
 0xec8   :  { %v2428_v63 = vpop.eup %2427  ;;  %v1598_v0 = vmul.f32 %v2426_v60, %v1566_v28  ;;  %v1795_v28 = vld [vmem:[%s3076_s16 + $0x20] sm:$0xff] }
 0xec9   :  { %v1597_v1 = vmul.f32 %v2428_v63, %v1565_v29  ;;  %v2328_v29 = vpack.c.bf16 %v1796_v39, %v1795_v28 }
 0xeca   :  { %v1608_v6 = vmul.f32 %v1927_v58, %v1598_v0 }
 0xecb   :  { %v1607_v42 = vmul.f32 %v1927_v58, %v1597_v1 }
 0xecc   :  { %v1618_v10 = vadd.f32 %v1928_v55, %v1608_v6 }
 0xecd   :  { %v1617_v46 = vadd.f32 %v1928_v55, %v1607_v42 }
 0xecf   :  { %v2316_v61 = vpack.c.bf16 %v1618_v10, %v1617_v46 }
 0xed1   :  { %2317 = vmatpush3.bf16.msra.mxu1 %v2316_v61 }
 0xed2   :  { %2318 = vmatprep.subr.bf16.mxu1 %v2442_v18 }
 0xed4   :  { %2167 = vmatmul.mubr.msk.f32.vlgmr.msra.gmra.mrb[18].mxu1 %vm371_vm3, %v2715_v59 }
 0xed5   :  { %2173 = vmatprep.mubr.msk.f32.mxu1 %vm2443_vm4, %v2438_v33 }
 0xf49   :  { %v1584_v49 = vpop.xlane.xlu1 %1583 }
 0xf4a   :  { %v1588_v53 = vmul.f32 0.015625, %v1584_v49  ;;  %v1581_v54 = vpop.xlane.xlu0 %1580 }
 0xf4b   :  { %v1587_v2 = vmul.f32 0.015625, %v1581_v54 }
 0xf4c   :  { %v1592_v3 = vadd.f32 1e-12, %v1588_v53 }
 0xf4d   :  { %v1591_v35 = vadd.f32 1e-12, %v1587_v2  ;;  %v1697_v22 = vpop.xlane.xlu1 %1696 }
 0xf4e   :  { %2429 = vrsqrt.f32 %v1592_v3  ;;  %v1777_v19 = vpop.xlane.xlu0 %1776  ;;  %v1698_v30 = vmax.f32 %v1697_v22, 1e-09 }
 0xf4f   :  { %2431 = vrsqrt.f32 %v1591_v35  ;;  %v1778_v20 = vmax.f32 %v1777_v19, 1e-09 }
 0xf51   :  { %v1780_v17 = vrot.slane %v1778_v20, 1 }
 0xf53   :  { %2433 = vrcp.f32 %v1780_v17 }
 0xf54   :  { %2435 = vrcp.f32 %v1698_v30 }
 0xf58   :  { %v2430_v38 = vpop.eup %2429 }
 0xf59   :  { %v2432_v4 = vpop.eup %2431  ;;  %v1600_v5 = vmul.f32 %v2430_v38, %v1568_v31 }
 0xf5a   :  { %v1599_v8 = vmul.f32 %v2432_v4, %v1567_v32 }
 0xf5b   :  { %v1610_v59 = vmul.f32 %v1927_v58, %v1600_v5 }
 0xf5c   :  { %v1609_v9 = vmul.f32 %v1927_v58, %v1599_v8 }
 0xf5d   :  { %v1620_v11 = vadd.f32 %v1928_v55, %v1610_v59  ;;  %v2434_v57 = vpop.eup %2433 }
 0xf5e   :  { %v1619_v7 = vadd.f32 %v1928_v55, %v1609_v9  ;;  %v2436_v48 = vpop.eup %2435 }
 0xf60   :  { %v2319_v14 = vpack.c.bf16 %v1620_v11, %v1619_v7 }
 0xf62   :  { %2320 = vmatpush3.bf16.msra.mxu1 %v2319_v14 }
 0xf63   :  { %2321 = vmatprep.subr.bf16.mxu1 %v2442_v18 }
 0xf65   :  { %2174 = vmatmul.mubr.msk.f32.vlgmr.msra.gmra.mrb[20].mxu1 %vm371_vm3, %v1701_v16 }
 0xf66   :  { %2323 = vmatpush3.bf16.msra.mxu1 %v2322_v23  ;;  %2192 = vmatprep.mubr.msk.f32.mxu1 %vm2443_vm4, %v2438_v33  ;;  %v1797_v33 = vld [vmem:[%s3076_s16 + $0x30] sm:$0xff] }
 0xf67   :  { %2324 = vmatprep.subr.bf16.mxu1 %v2442_v18  ;;  %v2331_v15 = vpack.c.bf16 %v1798_v21, %v1797_v33 }
 0xf6a   :  { %2326 = vmatpush3.bf16.msra.mxu1 %v2325_v26 }
 0xf6b   :  { %2327 = vmatprep.subr.bf16.mxu1 %v2442_v18 }
 0xf6e   :  { %2329 = vmatpush3.bf16.msra.mxu1 %v2328_v29 }
 0xf6f   :  { %2330 = vmatprep.subr.bf16.mxu1 %v2442_v18 }
 0xf72   :  { %2332 = vmatpush3.bf16.msra.mxu1 %v2331_v15 }
 0xfa7   :  { %v1690_v27 = vpop.f32.mrb[18].mxu1 }
 0xfa8   :  { %v2168_v43 = vpop.f32.mrb[19].mxu1  ;;  %v1700_v34 = vmul.f32 %v2436_v48, %v1690_v27 }
0x1038   :  { %v1770_v18 = vpop.f32.mrb[20].mxu1 }
0x1039   :  { %v1783_v31 = vmul.f32 %v2434_v57, %v1770_v18  ;;  %v2175_v32 = vpop.f32.mrb[21].mxu1 }
0x103b   :  { %v1785_v41 = vrot.slane %v1783_v31, 7 }
0x103d   :  { %v1788_v40 = vsel %vm1787_vm7, %v1700_v34, %v1785_v41 }
0x103e   :  { %v1790_v36 = vsel %vm1789_vm8, %v1788_v40, 0.0 }
0x103f   :  { %2193 = vmatmul.mubr.msk.f32.vlgmr.msra.gmra.mrb[22].mxu1 %vm66_vm0, %v1790_v36 }
0x1112   :  { %v1875_v44 = vpop.f32.mrb[22].mxu1 }
0x1113   :  { %v1876_v45 = vadd.f32 %v1931_v37, %v1875_v44  ;;  %v2194_v47 = vpop.f32.mrb[23].mxu1 }
0x1115   :  { %1879 = vst [vmem:[%s3078_s18] sm:$0xff] %v1876_v45 }

</bundles_post_ra>
